<compile_context>
chip_gen: v7x
topology: tpu7x:2x2x1
jax: 0.10.0
libtpu: 0.0.40
codegen_flags: <defaults>
</compile_context>

<pallas_src>
import functools

import numpy as np
import jax
import jax.numpy as jnp
from jax.experimental import pallas as pl
from jax.experimental.pallas import tpu as pltpu


def _leaky(x, slope):
    return jnp.where(x > 0, x, slope * x)


def _nr_recip(d):
    """EUP approximate reciprocal refined by one Newton-Raphson step."""
    r = pl.reciprocal(d, approx=True)
    return r * (2.0 - d * r)


# --------------------------- fused forward kernel ----------------------------

def fused_net_kernel(x_ref, kr_ref, ep_ref, src_ref, tgt_ref,
                     h1w1, h1w2, h1b2, a1w1, a1w2, a1b2, l1lw, l1lb, l1rw,
                     h2w1, h2w2, h2b2, a2w1, a2w2, a2b2, l2lw, l2lb, l2rw,
                     o_ref, *, alpha):
    f32 = jnp.float32
    x = x_ref[...]                                    # (N, F_in)
    kr = kr_ref[...]                                  # (E, n_comp)
    ep = ep_ref[...]                                  # (N, n_comp_p)
    n_nodes = x.shape[0]
    n_edges = kr.shape[0]
    src = src_ref[...]                                # (1, E) int32
    tgt = tgt_ref[...]                                # (1, E) int32

    # ---- graph operators, built ONCE and shared by both layers --------------
    node_iota = jax.lax.broadcasted_iota(jnp.int32, (n_nodes, n_edges), 0)
    St = jnp.where(node_iota == src, 1.0, 0.0)        # (N, E): sum per src group
    Tt = jnp.where(node_iota == tgt, 1.0, 0.0)        # (N, E): sum per tgt group
    S = St.T                                          # (E, N): gather x[src]
    counts = jnp.sum(Tt, axis=1, keepdims=True)       # (N, 1) in-degree (once)
    inv_counts = _nr_recip(jnp.maximum(counts, 1.0))
    # (N, 1, E) group membership mask for the per-group max (lane axis = edges,
    # so the max is a plain lane reduce; only safe leading-dim reshapes used).
    grp_mask = (jax.lax.broadcasted_iota(jnp.int32, (n_nodes, 1, n_edges), 0)
                == src[None, :, :])

    def sage_layer(x_in, hw1, hw2, hb2, aw1, aw2, ab2, llw, llb, lrw):
        # hmpnn MLP on edge features -> per-edge logits (E, in_c)
        eh = _leaky(jnp.dot(kr, hw1[...], preferred_element_type=f32), 0.2)
        w_raw = jnp.dot(eh, hw2[...], preferred_element_type=f32) + hb2[...]

        # PyG softmax over edges grouped by the source node, shifted by the
        # TRUE per-group max (robust for arbitrary logit ranges).
        masked = jnp.where(grp_mask, w_raw.T[None, :, :], -1e30)   # (N, in_c, E)
        node_max = jnp.max(masked, axis=-1)                        # (N, in_c)
        edge_max = jnp.dot(S, node_max, preferred_element_type=f32)  # gather back
        e = jnp.exp(w_raw - edge_max)
        gsum = jnp.dot(St, e, preferred_element_type=f32)          # (N, in_c)
        denom = jnp.dot(S, gsum, preferred_element_type=f32) + 1e-16
        out_weight = e * _nr_recip(denom)

        # message + mean aggregation over target nodes
        xj = jnp.dot(S, x_in, preferred_element_type=f32)          # (E, in_c)
        msg = out_weight * xj
        agg = jnp.dot(Tt, msg, preferred_element_type=f32) * inv_counts

        # ham MLP on node positional features -> (N, out_c)
        ph = _leaky(jnp.dot(ep, aw1[...], preferred_element_type=f32), 0.2)
        p_w = jnp.dot(ph, aw2[...], preferred_element_type=f32) + ab2[...]

        # combine: lin_l(agg) + alpha * leaky_relu(ham) + lin_r(x)
        out = jnp.dot(agg, llw[...], preferred_element_type=f32) + llb[...]
        out = out + alpha * _leaky(p_w, 0.01)
        out = out + jnp.dot(x_in, lrw[...], preferred_element_type=f32)
        return out

    # layer 1 (+ outer ReLU); `h` stays in VMEM/vregs, never touches HBM
    h = jnp.maximum(
        sage_layer(x, h1w1, h1w2, h1b2, a1w1, a1w2, a1b2, l1lw, l1lb, l1rw), 0.0)
    # layer 2
    out = sage_layer(h, h2w1, h2w2, h2b2, a2w1, a2w2, a2b2, l2lw, l2lb, l2rw)

    # fused final log_softmax over the (small, fully real) class axis
    m = jnp.max(out, axis=1, keepdims=True)
    z = out - m
    lse = jnp.log(jnp.sum(jnp.exp(z), axis=1, keepdims=True))
    o_ref[...] = z - lse


# ------------------------------ forward wrapper -------------------------------

def net_forward(params, x, edge_index, k_ricci, e_poinc, alpha):
    src_row = edge_index[0].astype(jnp.int32).reshape(1, -1)
    tgt_row = edge_index[1].astype(jnp.int32).reshape(1, -1)
    n_nodes = x.shape[0]
    num_classes = params['conv2']['lin_l_w'].shape[1]
    p1, p2 = params['conv1'], params['conv2']

    # TODO(synk): F.dropout(p=0.6 / 0.5, training=True) is stochastic; implemented
    # in eval mode (identity) for deterministic inference semantics.
    operands = (x, k_ricci, e_poinc, src_row, tgt_row,
                p1['hmpnn_w1'], p1['hmpnn_w2'], p1['hmpnn_b2'],
                p1['ham_w1'], p1['ham_w2'], p1['ham_b2'],
                p1['lin_l_w'], p1['lin_l_b'], p1['lin_r_w'],
                p2['hmpnn_w1'], p2['hmpnn_w2'], p2['hmpnn_b2'],
                p2['ham_w1'], p2['ham_w2'], p2['ham_b2'],
                p2['lin_l_w'], p2['lin_l_b'], p2['lin_r_w'])
    vmem = pl.BlockSpec(memory_space=pltpu.MemorySpace.VMEM)
    kernel = functools.partial(fused_net_kernel, alpha=float(alpha))
    # Single grid-less call: everything (<0.5 MiB) is VMEM-resident.
    # TODO(synk): at real graph sizes add a node/edge-tiled grid ("parallel"
    # node axis for v7x's 2 TCs) and replace the dense one-hot scatter with
    # scalar-prefetch indexed gathers; re-budget against 64 MiB VMEM on v7x.
    return pl.pallas_call(
        kernel,
        out_shape=jax.ShapeDtypeStruct((n_nodes, num_classes), jnp.float32),
        in_specs=[vmem] * len(operands),
        out_specs=vmem,
    )(*operands)


# --------------------------- parameter creation -------------------------------

def _init_linear(key, fan_in, fan_out, bias=True):
    k1, k2 = jax.random.split(key)
    bound = 1.0 / np.sqrt(fan_in)
    w = jax.random.uniform(k1, (fan_in, fan_out), jnp.float32, -bound, bound)
    b = (jax.random.uniform(k2, (1, fan_out), jnp.float32, -bound, bound)
         if bias else None)
    return w, b


def init_sage(key, in_c, out_c, n_comp, n_comp_p):
    ks = jax.random.split(key, 6)
    hmpnn_w1, _ = _init_linear(ks[0], n_comp, out_c, bias=False)
    hmpnn_w2, hmpnn_b2 = _init_linear(ks[1], out_c, in_c, bias=True)
    ham_w1, _ = _init_linear(ks[2], n_comp_p, out_c, bias=False)
    ham_w2, ham_b2 = _init_linear(ks[3], out_c, out_c, bias=True)
    lin_l_w, lin_l_b = _init_linear(ks[4], in_c, out_c, bias=True)
    lin_r_w, _ = _init_linear(ks[5], in_c, out_c, bias=False)
    return dict(hmpnn_w1=hmpnn_w1, hmpnn_w2=hmpnn_w2, hmpnn_b2=hmpnn_b2,
                ham_w1=ham_w1, ham_w2=ham_w2, ham_b2=ham_b2,
                lin_l_w=lin_l_w, lin_l_b=lin_l_b, lin_r_w=lin_r_w)


# --------------------------- pure-JAX reference --------------------------------

def _mm(a, b):
    return jnp.dot(a, b, precision=jax.lax.Precision.HIGHEST)


def _ref_sage(p, x, src, tgt, k_ricci, e_poinc, alpha, N):
    w_raw = _mm(_leaky(_mm(k_ricci, p['hmpnn_w1']), 0.2), p['hmpnn_w2']) + p['hmpnn_b2']
    gmax = jax.ops.segment_max(w_raw, src, num_segments=N)[src]
    e = jnp.exp(w_raw - gmax)
    denom = jax.ops.segment_sum(e, src, num_segments=N)[src] + 1e-16
    ow = e / denom
    msg = ow * x[src]
    ssum = jax.ops.segment_sum(msg, tgt, num_segments=N)
    cnt = jnp.maximum(
        jax.ops.segment_sum(jnp.ones((src.shape[0], 1)), tgt, num_segments=N), 1.0)
    agg = ssum / cnt
    out = _mm(agg, p['lin_l_w']) + p['lin_l_b']
    pw = _mm(_leaky(_mm(e_poinc, p['ham_w1']), 0.2), p['ham_w2']) + p['ham_b2']
    out = out + alpha * _leaky(pw, 0.01)
    out = out + _mm(x, p['lin_r_w'])
    return out


def _ref_net(params, x, edge_index, k_ricci, e_poinc, alpha):
    src, tgt = edge_index[0], edge_index[1]
    N = x.shape[0]
    h = jax.nn.relu(_ref_sage(params['conv1'], x, src, tgt, k_ricci, e_poinc, alpha, N))
    out = _ref_sage(params['conv2'], h, src, tgt, k_ricci, e_poinc, alpha, N)
    return jax.nn.log_softmax(out, axis=1)


# ------------------------------------ main -------------------------------------

if __name__ == "__main__":
    key = jax.random.PRNGKey(0)
    N, E = 16, 32
    num_features, num_hidden, num_classes = 8, 32, 4
    n_components, n_components_p = 8, 8

    ks = jax.random.split(key, 7)
    x = jax.random.normal(ks[0], (N, num_features), jnp.float32)
    src = jax.random.randint(ks[1], (E,), 0, N, dtype=jnp.int32)
    tgt = jax.random.randint(ks[2], (E,), 0, N, dtype=jnp.int32)
    edge_index = jnp.stack([src, tgt])                       # (2, E)
    k_ricci = jax.random.normal(ks[3], (E, n_components), jnp.float32)
    e_poinc = jax.random.normal(ks[4], (N, n_components_p), jnp.float32)

    params = {
        'conv1': init_sage(ks[5], num_features, num_hidden, n_components, n_components_p),
        'conv2': init_sage(ks[6], num_hidden, num_classes, n_components, n_components_p),
    }
    alpha = 1.0

    fwd = jax.jit(net_forward, static_argnums=(5,))
    out = jax.block_until_ready(fwd(params, x, edge_index, k_ricci, e_poinc, alpha))

    ref = _ref_net(params, x, edge_index, k_ricci, e_poinc, alpha)
    np.testing.assert_allclose(np.asarray(out), np.asarray(ref),
                               rtol=2e-4, atol=2e-4)
    print("KERNEL_OK")
</pallas_src>

<mosaic_0001>
module attributes {stable_mosaic.version = 11 : i64} {
  func.func @fused_net_kernel(%arg0: memref<16x8xf32, #tpu.memory_space<vmem>>, %arg1: memref<32x8xf32, #tpu.memory_space<vmem>>, %arg2: memref<16x8xf32, #tpu.memory_space<vmem>>, %arg3: memref<1x32xi32, #tpu.memory_space<vmem>>, %arg4: memref<1x32xi32, #tpu.memory_space<vmem>>, %arg5: memref<8x32xf32, #tpu.memory_space<vmem>>, %arg6: memref<32x8xf32, #tpu.memory_space<vmem>>, %arg7: memref<1x8xf32, #tpu.memory_space<vmem>>, %arg8: memref<8x32xf32, #tpu.memory_space<vmem>>, %arg9: memref<32x32xf32, #tpu.memory_space<vmem>>, %arg10: memref<1x32xf32, #tpu.memory_space<vmem>>, %arg11: memref<8x32xf32, #tpu.memory_space<vmem>>, %arg12: memref<1x32xf32, #tpu.memory_space<vmem>>, %arg13: memref<8x32xf32, #tpu.memory_space<vmem>>, %arg14: memref<8x4xf32, #tpu.memory_space<vmem>>, %arg15: memref<4x32xf32, #tpu.memory_space<vmem>>, %arg16: memref<1x32xf32, #tpu.memory_space<vmem>>, %arg17: memref<8x4xf32, #tpu.memory_space<vmem>>, %arg18: memref<4x4xf32, #tpu.memory_space<vmem>>, %arg19: memref<1x4xf32, #tpu.memory_space<vmem>>, %arg20: memref<32x4xf32, #tpu.memory_space<vmem>>, %arg21: memref<1x4xf32, #tpu.memory_space<vmem>>, %arg22: memref<32x4xf32, #tpu.memory_space<vmem>>, %arg23: memref<16x4xf32, #tpu.memory_space<vmem>>) attributes {dimension_semantics = [], scalar_prefetch = 0 : i64, scratch_operands = 0 : i64, tpu.core_type = #tpu.core_type<tc>} {
    %c0 = arith.constant 0 : index
    %c0_0 = arith.constant 0 : index
    %0 = vector.load %arg0[%c0, %c0_0] : memref<16x8xf32, #tpu.memory_space<vmem>>, vector<16x8xf32>
    %c0_1 = arith.constant 0 : index
    %c0_2 = arith.constant 0 : index
    %1 = vector.load %arg1[%c0_1, %c0_2] : memref<32x8xf32, #tpu.memory_space<vmem>>, vector<32x8xf32>
    %c0_3 = arith.constant 0 : index
    %c0_4 = arith.constant 0 : index
    %2 = vector.load %arg2[%c0_3, %c0_4] : memref<16x8xf32, #tpu.memory_space<vmem>>, vector<16x8xf32>
    %c0_5 = arith.constant 0 : index
    %c0_6 = arith.constant 0 : index
    %3 = vector.load %arg3[%c0_5, %c0_6] : memref<1x32xi32, #tpu.memory_space<vmem>>, vector<1x32xi32>
    %c0_7 = arith.constant 0 : index
    %c0_8 = arith.constant 0 : index
    %4 = vector.load %arg4[%c0_7, %c0_8] : memref<1x32xi32, #tpu.memory_space<vmem>>, vector<1x32xi32>
    %5 = tpu.iota {dimensions = array<i32: 0>} : vector<16x32xi32>
    %6 = vector.broadcast %3 : vector<1x32xi32> to vector<16x32xi32>
    %7 = arith.cmpi eq, %5, %6 : vector<16x32xi32>
    %cst = arith.constant 1.000000e+00 : f32
    %cst_9 = arith.constant 0.000000e+00 : f32
    %8 = vector.broadcast %cst : f32 to vector<16x32xf32>
    %9 = vector.broadcast %cst_9 : f32 to vector<16x32xf32>
    %10 = arith.select %7, %8, %9 : vector<16x32xi1>, vector<16x32xf32>
    %11 = vector.broadcast %4 : vector<1x32xi32> to vector<16x32xi32>
    %12 = arith.cmpi eq, %5, %11 : vector<16x32xi32>
    %cst_10 = arith.constant 1.000000e+00 : f32
    %cst_11 = arith.constant 0.000000e+00 : f32
    %13 = vector.broadcast %cst_10 : f32 to vector<16x32xf32>
    %14 = vector.broadcast %cst_11 : f32 to vector<16x32xf32>
    %15 = arith.select %12, %13, %14 : vector<16x32xi1>, vector<16x32xf32>
    %16 = tpu.transpose %10, [1, 0] : vector<16x32xf32> -> vector<32x16xf32>
    %cst_12 = arith.constant dense<0.000000e+00> : vector<16xf32>
    %17 = vector.multi_reduction <add>, %15, %cst_12 [1] : vector<16x32xf32> to vector<16xf32>
    %18 = vector.shape_cast %17 : vector<16xf32> to vector<16x1xf32>
    %cst_13 = arith.constant 1.000000e+00 : f32
    %19 = vector.broadcast %cst_13 : f32 to vector<16x1xf32>
    %20 = arith.maximumf %18, %19 : vector<16x1xf32>
    %21 = tpu.reciprocal %20 {approx = true} : vector<16x1xf32> -> vector<16x1xf32>
    %22 = arith.mulf %20, %21 : vector<16x1xf32>
    %cst_14 = arith.constant 2.000000e+00 : f32
    %23 = vector.broadcast %cst_14 : f32 to vector<16x1xf32>
    %24 = arith.subf %23, %22 : vector<16x1xf32>
    %25 = arith.mulf %21, %24 : vector<16x1xf32>
    %26 = tpu.iota {dimensions = array<i32: 0>} : vector<16x1x32xi32>
    %27 = vector.shape_cast %3 : vector<1x32xi32> to vector<1x1x32xi32>
    %28 = vector.broadcast %27 : vector<1x1x32xi32> to vector<16x1x32xi32>
    %29 = arith.cmpi eq, %26, %28 : vector<16x1x32xi32>
    %c0_15 = arith.constant 0 : index
    %c0_16 = arith.constant 0 : index
    %30 = vector.load %arg5[%c0_15, %c0_16] : memref<8x32xf32, #tpu.memory_space<vmem>>, vector<8x32xf32>
    %cst_17 = arith.constant dense<0.000000e+00> : vector<32x32xf32>
    %31 = tpu.matmul %1, %30, %cst_17 {dimension_numbers = #tpu.dot_dimension_numbers<[1], [0], [0], [1], [0, 0, 1, 1], [], []>} : vector<32x8xf32>, vector<8x32xf32>, vector<32x32xf32> -> vector<32x32xf32>
    %cst_18 = arith.constant 0.000000e+00 : f32
    %32 = vector.broadcast %cst_18 : f32 to vector<32x32xf32>
    %33 = arith.cmpf ogt, %31, %32 : vector<32x32xf32>
    %cst_19 = arith.constant 2.000000e-01 : f32
    %34 = vector.broadcast %cst_19 : f32 to vector<32x32xf32>
    %35 = arith.mulf %34, %31 : vector<32x32xf32>
    %36 = arith.select %33, %31, %35 : vector<32x32xi1>, vector<32x32xf32>
    %c0_20 = arith.constant 0 : index
    %c0_21 = arith.constant 0 : index
    %37 = vector.load %arg6[%c0_20, %c0_21] : memref<32x8xf32, #tpu.memory_space<vmem>>, vector<32x8xf32>
    %cst_22 = arith.constant dense<0.000000e+00> : vector<32x8xf32>
    %38 = tpu.matmul %36, %37, %cst_22 {dimension_numbers = #tpu.dot_dimension_numbers<[1], [0], [0], [1], [0, 0, 1, 1], [], []>} : vector<32x32xf32>, vector<32x8xf32>, vector<32x8xf32> -> vector<32x8xf32>
    %c0_23 = arith.constant 0 : index
    %c0_24 = arith.constant 0 : index
    %39 = vector.load %arg7[%c0_23, %c0_24] : memref<1x8xf32, #tpu.memory_space<vmem>>, vector<1x8xf32>
    %40 = vector.broadcast %39 : vector<1x8xf32> to vector<32x8xf32>
    %41 = arith.addf %38, %40 : vector<32x8xf32>
    %42 = tpu.transpose %41, [1, 0] : vector<32x8xf32> -> vector<8x32xf32>
    %43 = vector.shape_cast %42 : vector<8x32xf32> to vector<1x8x32xf32>
    %cst_25 = arith.constant -1.000000e+30 : f32
    %44 = vector.shape_cast %29 : vector<16x1x32xi1> to vector<16x1x32xi1>
    %45 = vector.broadcast %44 : vector<16x1x32xi1> to vector<16x8x32xi1>
    %46 = vector.shape_cast %43 : vector<1x8x32xf32> to vector<1x8x32xf32>
    %47 = vector.broadcast %46 : vector<1x8x32xf32> to vector<16x8x32xf32>
    %48 = vector.broadcast %cst_25 : f32 to vector<16x8x32xf32>
    %49 = arith.select %45, %47, %48 : vector<16x8x32xi1>, vector<16x8x32xf32>
    %cst_26 = arith.constant dense<0xFF800000> : vector<16x8xf32>
    %50 = vector.multi_reduction <maximumf>, %49, %cst_26 [2] : vector<16x8x32xf32> to vector<16x8xf32>
    %cst_27 = arith.constant dense<0.000000e+00> : vector<32x8xf32>
    %51 = tpu.matmul %16, %50, %cst_27 {dimension_numbers = #tpu.dot_dimension_numbers<[1], [0], [0], [1], [0, 0, 1, 1], [], []>} : vector<32x16xf32>, vector<16x8xf32>, vector<32x8xf32> -> vector<32x8xf32>
    %52 = arith.subf %41, %51 : vector<32x8xf32>
    %53 = math.exp %52 : vector<32x8xf32>
    %cst_28 = arith.constant dense<0.000000e+00> : vector<16x8xf32>
    %54 = tpu.matmul %10, %53, %cst_28 {dimension_numbers = #tpu.dot_dimension_numbers<[1], [0], [0], [1], [0, 0, 1, 1], [], []>} : vector<16x32xf32>, vector<32x8xf32>, vector<16x8xf32> -> vector<16x8xf32>
    %cst_29 = arith.constant dense<0.000000e+00> : vector<32x8xf32>
    %55 = tpu.matmul %16, %54, %cst_29 {dimension_numbers = #tpu.dot_dimension_numbers<[1], [0], [0], [1], [0, 0, 1, 1], [], []>} : vector<32x16xf32>, vector<16x8xf32>, vector<32x8xf32> -> vector<32x8xf32>
    %cst_30 = arith.constant 1.000000e-16 : f32
    %56 = vector.broadcast %cst_30 : f32 to vector<32x8xf32>
    %57 = arith.addf %55, %56 : vector<32x8xf32>
    %58 = tpu.reciprocal %57 {approx = true} : vector<32x8xf32> -> vector<32x8xf32>
    %59 = arith.mulf %57, %58 : vector<32x8xf32>
    %cst_31 = arith.constant 2.000000e+00 : f32
    %60 = vector.broadcast %cst_31 : f32 to vector<32x8xf32>
    %61 = arith.subf %60, %59 : vector<32x8xf32>
    %62 = arith.mulf %58, %61 : vector<32x8xf32>
    %63 = arith.mulf %53, %62 : vector<32x8xf32>
    %cst_32 = arith.constant dense<0.000000e+00> : vector<32x8xf32>
    %64 = tpu.matmul %16, %0, %cst_32 {dimension_numbers = #tpu.dot_dimension_numbers<[1], [0], [0], [1], [0, 0, 1, 1], [], []>} : vector<32x16xf32>, vector<16x8xf32>, vector<32x8xf32> -> vector<32x8xf32>
    %65 = arith.mulf %63, %64 : vector<32x8xf32>
    %cst_33 = arith.constant dense<0.000000e+00> : vector<16x8xf32>
    %66 = tpu.matmul %15, %65, %cst_33 {dimension_numbers = #tpu.dot_dimension_numbers<[1], [0], [0], [1], [0, 0, 1, 1], [], []>} : vector<16x32xf32>, vector<32x8xf32>, vector<16x8xf32> -> vector<16x8xf32>
    %67 = vector.broadcast %25 : vector<16x1xf32> to vector<16x8xf32>
    %68 = arith.mulf %66, %67 : vector<16x8xf32>
    %c0_34 = arith.constant 0 : index
    %c0_35 = arith.constant 0 : index
    %69 = vector.load %arg8[%c0_34, %c0_35] : memref<8x32xf32, #tpu.memory_space<vmem>>, vector<8x32xf32>
    %cst_36 = arith.constant dense<0.000000e+00> : vector<16x32xf32>
    %70 = tpu.matmul %2, %69, %cst_36 {dimension_numbers = #tpu.dot_dimension_numbers<[1], [0], [0], [1], [0, 0, 1, 1], [], []>} : vector<16x8xf32>, vector<8x32xf32>, vector<16x32xf32> -> vector<16x32xf32>
    %cst_37 = arith.constant 0.000000e+00 : f32
    %71 = vector.broadcast %cst_37 : f32 to vector<16x32xf32>
    %72 = arith.cmpf ogt, %70, %71 : vector<16x32xf32>
    %cst_38 = arith.constant 2.000000e-01 : f32
    %73 = vector.broadcast %cst_38 : f32 to vector<16x32xf32>
    %74 = arith.mulf %73, %70 : vector<16x32xf32>
    %75 = arith.select %72, %70, %74 : vector<16x32xi1>, vector<16x32xf32>
    %c0_39 = arith.constant 0 : index
    %c0_40 = arith.constant 0 : index
    %76 = vector.load %arg9[%c0_39, %c0_40] : memref<32x32xf32, #tpu.memory_space<vmem>>, vector<32x32xf32>
    %cst_41 = arith.constant dense<0.000000e+00> : vector<16x32xf32>
    %77 = tpu.matmul %75, %76, %cst_41 {dimension_numbers = #tpu.dot_dimension_numbers<[1], [0], [0], [1], [0, 0, 1, 1], [], []>} : vector<16x32xf32>, vector<32x32xf32>, vector<16x32xf32> -> vector<16x32xf32>
    %c0_42 = arith.constant 0 : index
    %c0_43 = arith.constant 0 : index
    %78 = vector.load %arg10[%c0_42, %c0_43] : memref<1x32xf32, #tpu.memory_space<vmem>>, vector<1x32xf32>
    %79 = vector.broadcast %78 : vector<1x32xf32> to vector<16x32xf32>
    %80 = arith.addf %77, %79 : vector<16x32xf32>
    %c0_44 = arith.constant 0 : index
    %c0_45 = arith.constant 0 : index
    %81 = vector.load %arg11[%c0_44, %c0_45] : memref<8x32xf32, #tpu.memory_space<vmem>>, vector<8x32xf32>
    %cst_46 = arith.constant dense<0.000000e+00> : vector<16x32xf32>
    %82 = tpu.matmul %68, %81, %cst_46 {dimension_numbers = #tpu.dot_dimension_numbers<[1], [0], [0], [1], [0, 0, 1, 1], [], []>} : vector<16x8xf32>, vector<8x32xf32>, vector<16x32xf32> -> vector<16x32xf32>
    %c0_47 = arith.constant 0 : index
    %c0_48 = arith.constant 0 : index
    %83 = vector.load %arg12[%c0_47, %c0_48] : memref<1x32xf32, #tpu.memory_space<vmem>>, vector<1x32xf32>
    %84 = vector.broadcast %83 : vector<1x32xf32> to vector<16x32xf32>
    %85 = arith.addf %82, %84 : vector<16x32xf32>
    %cst_49 = arith.constant 0.000000e+00 : f32
    %86 = vector.broadcast %cst_49 : f32 to vector<16x32xf32>
    %87 = arith.cmpf ogt, %80, %86 : vector<16x32xf32>
    %cst_50 = arith.constant 0.00999999977 : f32
    %88 = vector.broadcast %cst_50 : f32 to vector<16x32xf32>
    %89 = arith.mulf %88, %80 : vector<16x32xf32>
    %90 = arith.select %87, %80, %89 : vector<16x32xi1>, vector<16x32xf32>
    %cst_51 = arith.constant 1.000000e+00 : f32
    %91 = vector.broadcast %cst_51 : f32 to vector<16x32xf32>
    %92 = arith.mulf %91, %90 : vector<16x32xf32>
    %93 = arith.addf %85, %92 : vector<16x32xf32>
    %c0_52 = arith.constant 0 : index
    %c0_53 = arith.constant 0 : index
    %94 = vector.load %arg13[%c0_52, %c0_53] : memref<8x32xf32, #tpu.memory_space<vmem>>, vector<8x32xf32>
    %cst_54 = arith.constant dense<0.000000e+00> : vector<16x32xf32>
    %95 = tpu.matmul %0, %94, %cst_54 {dimension_numbers = #tpu.dot_dimension_numbers<[1], [0], [0], [1], [0, 0, 1, 1], [], []>} : vector<16x8xf32>, vector<8x32xf32>, vector<16x32xf32> -> vector<16x32xf32>
    %96 = arith.addf %93, %95 : vector<16x32xf32>
    %cst_55 = arith.constant 0.000000e+00 : f32
    %97 = vector.broadcast %cst_55 : f32 to vector<16x32xf32>
    %98 = arith.maximumf %96, %97 : vector<16x32xf32>
    %c0_56 = arith.constant 0 : index
    %c0_57 = arith.constant 0 : index
    %99 = vector.load %arg14[%c0_56, %c0_57] : memref<8x4xf32, #tpu.memory_space<vmem>>, vector<8x4xf32>
    %cst_58 = arith.constant dense<0.000000e+00> : vector<32x4xf32>
    %100 = tpu.matmul %1, %99, %cst_58 {dimension_numbers = #tpu.dot_dimension_numbers<[1], [0], [0], [1], [0, 0, 1, 1], [], []>} : vector<32x8xf32>, vector<8x4xf32>, vector<32x4xf32> -> vector<32x4xf32>
    %cst_59 = arith.constant 0.000000e+00 : f32
    %101 = vector.broadcast %cst_59 : f32 to vector<32x4xf32>
    %102 = arith.cmpf ogt, %100, %101 : vector<32x4xf32>
    %cst_60 = arith.constant 2.000000e-01 : f32
    %103 = vector.broadcast %cst_60 : f32 to vector<32x4xf32>
    %104 = arith.mulf %103, %100 : vector<32x4xf32>
    %105 = arith.select %102, %100, %104 : vector<32x4xi1>, vector<32x4xf32>
    %c0_61 = arith.constant 0 : index
    %c0_62 = arith.constant 0 : index
    %106 = vector.load %arg15[%c0_61, %c0_62] : memref<4x32xf32, #tpu.memory_space<vmem>>, vector<4x32xf32>
    %cst_63 = arith.constant dense<0.000000e+00> : vector<32x32xf32>
    %107 = tpu.matmul %105, %106, %cst_63 {dimension_numbers = #tpu.dot_dimension_numbers<[1], [0], [0], [1], [0, 0, 1, 1], [], []>} : vector<32x4xf32>, vector<4x32xf32>, vector<32x32xf32> -> vector<32x32xf32>
    %c0_64 = arith.constant 0 : index
    %c0_65 = arith.constant 0 : index
    %108 = vector.load %arg16[%c0_64, %c0_65] : memref<1x32xf32, #tpu.memory_space<vmem>>, vector<1x32xf32>
    %109 = vector.broadcast %108 : vector<1x32xf32> to vector<32x32xf32>
    %110 = arith.addf %107, %109 : vector<32x32xf32>
    %111 = tpu.transpose %110, [1, 0] : vector<32x32xf32> -> vector<32x32xf32>
    %112 = vector.shape_cast %111 : vector<32x32xf32> to vector<1x32x32xf32>
    %cst_66 = arith.constant -1.000000e+30 : f32
    %113 = vector.shape_cast %29 : vector<16x1x32xi1> to vector<16x1x32xi1>
    %114 = vector.broadcast %113 : vector<16x1x32xi1> to vector<16x32x32xi1>
    %115 = vector.shape_cast %112 : vector<1x32x32xf32> to vector<1x32x32xf32>
    %116 = vector.broadcast %115 : vector<1x32x32xf32> to vector<16x32x32xf32>
    %117 = vector.broadcast %cst_66 : f32 to vector<16x32x32xf32>
    %118 = arith.select %114, %116, %117 : vector<16x32x32xi1>, vector<16x32x32xf32>
    %cst_67 = arith.constant dense<0xFF800000> : vector<16x32xf32>
    %119 = vector.multi_reduction <maximumf>, %118, %cst_67 [2] : vector<16x32x32xf32> to vector<16x32xf32>
    %cst_68 = arith.constant dense<0.000000e+00> : vector<32x32xf32>
    %120 = tpu.matmul %16, %119, %cst_68 {dimension_numbers = #tpu.dot_dimension_numbers<[1], [0], [0], [1], [0, 0, 1, 1], [], []>} : vector<32x16xf32>, vector<16x32xf32>, vector<32x32xf32> -> vector<32x32xf32>
    %121 = arith.subf %110, %120 : vector<32x32xf32>
    %122 = math.exp %121 : vector<32x32xf32>
    %cst_69 = arith.constant dense<0.000000e+00> : vector<16x32xf32>
    %123 = tpu.matmul %10, %122, %cst_69 {dimension_numbers = #tpu.dot_dimension_numbers<[1], [0], [0], [1], [0, 0, 1, 1], [], []>} : vector<16x32xf32>, vector<32x32xf32>, vector<16x32xf32> -> vector<16x32xf32>
    %cst_70 = arith.constant dense<0.000000e+00> : vector<32x32xf32>
    %124 = tpu.matmul %16, %123, %cst_70 {dimension_numbers = #tpu.dot_dimension_numbers<[1], [0], [0], [1], [0, 0, 1, 1], [], []>} : vector<32x16xf32>, vector<16x32xf32>, vector<32x32xf32> -> vector<32x32xf32>
    %cst_71 = arith.constant 1.000000e-16 : f32
    %125 = vector.broadcast %cst_71 : f32 to vector<32x32xf32>
    %126 = arith.addf %124, %125 : vector<32x32xf32>
    %127 = tpu.reciprocal %126 {approx = true} : vector<32x32xf32> -> vector<32x32xf32>
    %128 = arith.mulf %126, %127 : vector<32x32xf32>
    %cst_72 = arith.constant 2.000000e+00 : f32
    %129 = vector.broadcast %cst_72 : f32 to vector<32x32xf32>
    %130 = arith.subf %129, %128 : vector<32x32xf32>
    %131 = arith.mulf %127, %130 : vector<32x32xf32>
    %132 = arith.mulf %122, %131 : vector<32x32xf32>
    %cst_73 = arith.constant dense<0.000000e+00> : vector<32x32xf32>
    %133 = tpu.matmul %16, %98, %cst_73 {dimension_numbers = #tpu.dot_dimension_numbers<[1], [0], [0], [1], [0, 0, 1, 1], [], []>} : vector<32x16xf32>, vector<16x32xf32>, vector<32x32xf32> -> vector<32x32xf32>
    %134 = arith.mulf %132, %133 : vector<32x32xf32>
    %cst_74 = arith.constant dense<0.000000e+00> : vector<16x32xf32>
    %135 = tpu.matmul %15, %134, %cst_74 {dimension_numbers = #tpu.dot_dimension_numbers<[1], [0], [0], [1], [0, 0, 1, 1], [], []>} : vector<16x32xf32>, vector<32x32xf32>, vector<16x32xf32> -> vector<16x32xf32>
    %136 = vector.broadcast %25 : vector<16x1xf32> to vector<16x32xf32>
    %137 = arith.mulf %135, %136 : vector<16x32xf32>
    %c0_75 = arith.constant 0 : index
    %c0_76 = arith.constant 0 : index
    %138 = vector.load %arg17[%c0_75, %c0_76] : memref<8x4xf32, #tpu.memory_space<vmem>>, vector<8x4xf32>
    %cst_77 = arith.constant dense<0.000000e+00> : vector<16x4xf32>
    %139 = tpu.matmul %2, %138, %cst_77 {dimension_numbers = #tpu.dot_dimension_numbers<[1], [0], [0], [1], [0, 0, 1, 1], [], []>} : vector<16x8xf32>, vector<8x4xf32>, vector<16x4xf32> -> vector<16x4xf32>
    %cst_78 = arith.constant 0.000000e+00 : f32
    %140 = vector.broadcast %cst_78 : f32 to vector<16x4xf32>
    %141 = arith.cmpf ogt, %139, %140 : vector<16x4xf32>
    %cst_79 = arith.constant 2.000000e-01 : f32
    %142 = vector.broadcast %cst_79 : f32 to vector<16x4xf32>
    %143 = arith.mulf %142, %139 : vector<16x4xf32>
    %144 = arith.select %141, %139, %143 : vector<16x4xi1>, vector<16x4xf32>
    %c0_80 = arith.constant 0 : index
    %c0_81 = arith.constant 0 : index
    %145 = vector.load %arg18[%c0_80, %c0_81] : memref<4x4xf32, #tpu.memory_space<vmem>>, vector<4x4xf32>
    %cst_82 = arith.constant dense<0.000000e+00> : vector<16x4xf32>
    %146 = tpu.matmul %144, %145, %cst_82 {dimension_numbers = #tpu.dot_dimension_numbers<[1], [0], [0], [1], [0, 0, 1, 1], [], []>} : vector<16x4xf32>, vector<4x4xf32>, vector<16x4xf32> -> vector<16x4xf32>
    %c0_83 = arith.constant 0 : index
    %c0_84 = arith.constant 0 : index
    %147 = vector.load %arg19[%c0_83, %c0_84] : memref<1x4xf32, #tpu.memory_space<vmem>>, vector<1x4xf32>
    %148 = vector.broadcast %147 : vector<1x4xf32> to vector<16x4xf32>
    %149 = arith.addf %146, %148 : vector<16x4xf32>
    %c0_85 = arith.constant 0 : index
    %c0_86 = arith.constant 0 : index
    %150 = vector.load %arg20[%c0_85, %c0_86] : memref<32x4xf32, #tpu.memory_space<vmem>>, vector<32x4xf32>
    %cst_87 = arith.constant dense<0.000000e+00> : vector<16x4xf32>
    %151 = tpu.matmul %137, %150, %cst_87 {dimension_numbers = #tpu.dot_dimension_numbers<[1], [0], [0], [1], [0, 0, 1, 1], [], []>} : vector<16x32xf32>, vector<32x4xf32>, vector<16x4xf32> -> vector<16x4xf32>
    %c0_88 = arith.constant 0 : index
    %c0_89 = arith.constant 0 : index
    %152 = vector.load %arg21[%c0_88, %c0_89] : memref<1x4xf32, #tpu.memory_space<vmem>>, vector<1x4xf32>
    %153 = vector.broadcast %152 : vector<1x4xf32> to vector<16x4xf32>
    %154 = arith.addf %151, %153 : vector<16x4xf32>
    %cst_90 = arith.constant 0.000000e+00 : f32
    %155 = vector.broadcast %cst_90 : f32 to vector<16x4xf32>
    %156 = arith.cmpf ogt, %149, %155 : vector<16x4xf32>
    %cst_91 = arith.constant 0.00999999977 : f32
    %157 = vector.broadcast %cst_91 : f32 to vector<16x4xf32>
    %158 = arith.mulf %157, %149 : vector<16x4xf32>
    %159 = arith.select %156, %149, %158 : vector<16x4xi1>, vector<16x4xf32>
    %cst_92 = arith.constant 1.000000e+00 : f32
    %160 = vector.broadcast %cst_92 : f32 to vector<16x4xf32>
    %161 = arith.mulf %160, %159 : vector<16x4xf32>
    %162 = arith.addf %154, %161 : vector<16x4xf32>
    %c0_93 = arith.constant 0 : index
    %c0_94 = arith.constant 0 : index
    %163 = vector.load %arg22[%c0_93, %c0_94] : memref<32x4xf32, #tpu.memory_space<vmem>>, vector<32x4xf32>
    %cst_95 = arith.constant dense<0.000000e+00> : vector<16x4xf32>
    %164 = tpu.matmul %98, %163, %cst_95 {dimension_numbers = #tpu.dot_dimension_numbers<[1], [0], [0], [1], [0, 0, 1, 1], [], []>} : vector<16x32xf32>, vector<32x4xf32>, vector<16x4xf32> -> vector<16x4xf32>
    %165 = arith.addf %162, %164 : vector<16x4xf32>
    %cst_96 = arith.constant dense<0xFF800000> : vector<16xf32>
    %166 = vector.multi_reduction <maximumf>, %165, %cst_96 [1] : vector<16x4xf32> to vector<16xf32>
    %167 = vector.shape_cast %166 : vector<16xf32> to vector<16x1xf32>
    %168 = vector.broadcast %167 : vector<16x1xf32> to vector<16x4xf32>
    %169 = arith.subf %165, %168 : vector<16x4xf32>
    %170 = math.exp %169 : vector<16x4xf32>
    %cst_97 = arith.constant dense<0.000000e+00> : vector<16xf32>
    %171 = vector.multi_reduction <add>, %170, %cst_97 [1] : vector<16x4xf32> to vector<16xf32>
    %172 = vector.shape_cast %171 : vector<16xf32> to vector<16x1xf32>
    %173 = math.log %172 : vector<16x1xf32>
    %174 = vector.broadcast %173 : vector<16x1xf32> to vector<16x4xf32>
    %175 = arith.subf %169, %174 : vector<16x4xf32>
    %c0_98 = arith.constant 0 : index
    %c0_99 = arith.constant 0 : index
    %176 = vector.load %arg23[%c0_98, %c0_99] : memref<16x4xf32, #tpu.memory_space<vmem>>, vector<16x4xf32>
    tpu.vector_store %arg23[%c0_98, %c0_99], %175 {strides = array<i32>} : memref<16x4xf32, #tpu.memory_space<vmem>>, vector<16x4xf32>,
    return
  }
}

</mosaic_0001>

<bundles_post_ra>
// kernel: net_forward.1
= control target key start
LH: loop header
LB: loop body
LE: loop exit
PB: predicated region body
PF: predicated region fallthrough
CT: control target
= control target key end

     0   :  { %vm5003_vm0 = vcmask 64512   ;;  %vm5008_vm2 = vcmask 261120   ;;  %v84_v23 = vlaneseq  ;;  %v3772_v30 = vmov 0   ;;  %s4976_s5 = inlined_call_operand.vmem [shape: f32[8,32], index: 5, kind: input, shape index: {}]   ;;  %s4977_s1 = inlined_call_operand.vmem [shape: f32[32,8], index: 1, kind: input, shape index: {}]   ;;  %s4978_s6 = inlined_call_operand.vmem [shape: f32[32,8], index: 6, kind: input, shape index: {}]   ;;  %s4979_s7 = inlined_call_operand.vmem [shape: f32[1,8], index: 7, kind: input, shape index: {}]   ;;  %s4980_s3 = inlined_call_operand.vmem [shape: s32[1,32], index: 3, kind: input, shape index: {}]   ;;  %s4981_s0 = inlined_call_operand.vmem [shape: f32[16,8], index: 0, kind: input, shape index: {}]   ;;  %s4982_s4 = inlined_call_operand.vmem [shape: s32[1,32], index: 4, kind: input, shape index: {}]   ;;  %s4983_s8 = inlined_call_operand.vmem [shape: f32[8,32], index: 8, kind: input, shape index: {}]   ;;  %s4984_s2 = inlined_call_operand.vmem [shape: f32[16,8], index: 2, kind: input, shape index: {}]   ;;  %s4985_s9 = inlined_call_operand.vmem [shape: f32[32,32], index: 9, kind: input, shape index: {}]   ;;  %s4986_s11 = inlined_call_operand.vmem [shape: f32[8,32], index: 11, kind: input, shape index: {}]   ;;  %s4987_s13 = inlined_call_operand.vmem [shape: f32[8,32], index: 13, kind: input, shape index: {}]   ;;  %s4988_s14 = inlined_call_operand.vmem [shape: f32[8,4], index: 14, kind: input, shape index: {}]   ;;  %s4989_s15 = inlined_call_operand.vmem [shape: f32[4,32], index: 15, kind: input, shape index: {}]   ;;  %s4990_s10 = inlined_call_operand.vmem [shape: f32[1,32], index: 10, kind: input, shape index: {}]   ;;  %s4991_s12 = inlined_call_operand.vmem [shape: f32[1,32], index: 12, kind: input, shape index: {}]   ;;  %s4992_s16 = inlined_call_operand.vmem [shape: f32[1,32], index: 16, kind: input, shape index: {}]   ;;  %s4993_s17 = inlined_call_operand.vmem [shape: f32[8,4], index: 17, kind: input, shape index: {}]   ;;  %s4994_s20 = inlined_call_operand.vmem [shape: f32[32,4], index: 20, kind: input, shape index: {}]   ;;  %s4995_s18 = inlined_call_operand.vmem [shape: f32[4,4], index: 18, kind: input, shape index: {}]   ;;  %s4996_s22 = inlined_call_operand.vmem [shape: f32[32,4], index: 22, kind: input, shape index: {}]   ;;  %s4997_s19 = inlined_call_operand.vmem [shape: f32[1,4], index: 19, kind: input, shape index: {}]   ;;  %s4998_s21 = inlined_call_operand.vmem [shape: f32[1,4], index: 21, kind: input, shape index: {}]   ;;  %s4999_s23 = inlined_call_operand.vmem [shape: f32[16,4], index: 23, kind: output, shape index: {}]  }
   0x1   :  { %5039 = sst [smem:[#allocation7_spill]] %s4976_s5 }
   0x2   :  { %5040 = sst [smem:[#allocation8_spill]] %s4977_s1  ;;  %s5047_s24 = sld [smem:[#allocation7_spill]]  ;;  %v3942_v24 = vshrl.u32 %v84_v23, 7 }
   0x3   :  { %5041 = sst [smem:[#allocation9_spill]] %s4978_s6  ;;  %s5048_s1 = sld [smem:[#allocation8_spill]] }
   0x4   :  { %5042 = sst [smem:[#allocation10_spill]] %s4979_s7  ;;  %s5049_s29 = sld [smem:[#allocation9_spill]]  ;;  %v3953_v28 = vsub.s32 0, %v3942_v24 }
   0x5   :  { %5043 = sst [smem:[#allocation11_spill]] %s4980_s3  ;;  %s5050_s6 = sld [smem:[#allocation10_spill]] }
   0x6   :  { %5044 = sst [smem:[#allocation12_spill]] %s4981_s0  ;;  %s5051_s28 = sld [smem:[#allocation11_spill]] }
   0x7   :  { %5045 = sst [smem:[#allocation13_spill]] %s4982_s4  ;;  %s5093_s5 = sld [smem:[#allocation12_spill]] }
   0x8   :  { %5046 = sst [smem:[#allocation14_spill]] %s4983_s8  ;;  %v168_v0 = vld [vmem:[%s5047_s24] sm:$0xff]  ;;  %s5095_s0 = sld [smem:[#allocation13_spill]] }
   0x9   :  { %v3900_v1 = vld [vmem:[%s5048_s1] sm:$0xff]  ;;  %v3905_v2 = vld [vmem:[%s5048_s1 + $0x8] sm:$0xff]  ;;  %3424 = vmatprep.subr.mxu0 %v168_v0  ;;  %v3912_v3 = vld [vmem:[%s5048_s1 + $0x10] sm:$0xff]  ;;  %s5101_s26 = sld [smem:[#allocation14_spill]] }
   0xa   :  { %3426 = vmatprep.mubr.msk.f32.mxu0 %vm5003_vm0, %v3900_v1  ;;  %v279_v4 = vld [vmem:[%s5049_s29] sm:$0xff]  ;;  %3425 = vmatpush3.msra.mxu0 %v168_v0  ;;  %v280_v5 = vld [vmem:[%s5049_s29 + $0x8] sm:$0xff]  ;;  %v3927_v7 = vld [vmem:[%s5048_s1 + $0x18] sm:$0xff] }
   0xb   :  { %3427 = vmatmul.mubr.msk.f32.vlgmr.msra.gmra.mrb[0].mxu0 %vm5003_vm0, %v3905_v2  ;;  %v3624_v6 = vpack.c.bf16 %v280_v5, %v279_v4  ;;  %v281_v8 = vld [vmem:[%s5049_s29 + $0x10] sm:$0xff]  ;;  %v282_v9 = vld [vmem:[%s5049_s29 + $0x18] sm:$0xff]  ;;  %v3240_v25 = vld [vmem:[%s5050_s6] ss:$0 sm:$0xff] }
   0xc   :  { %3429 = vmatprep.mubr.msk.f32.mxu0 %vm5003_vm0, %v3912_v3  ;;  %v3628_v10 = vpack.c.bf16 %v282_v9, %v281_v8  ;;  %v3950_v26 = vld [vmem:[%s5051_s28] sm:$0x1] }
   0xd   :  { %3625 = vmatprep.subr.bf16.mxu1 %v3624_v6  ;;  %vm154_vm6 = vcmp.eq.s32.totalorder %v3950_v26, 2  ;;  %vm152_vm7 = vcmp.eq.s32.totalorder %v3950_v26, 0  ;;  %vm153_vm8 = vcmp.eq.s32.totalorder %v3950_v26, 1  ;;  %vm160_vm9 = vcmp.eq.s32.totalorder %v3950_v26, 8 }
   0xe   :  { %3627 = vmatpush3.bf16.msra.mxu1 %v3624_v6  ;;  %v421_v31 = vsel %vm154_vm6, 1, %v3772_v30  ;;  %v419_v32 = vsel %vm152_vm7, 1, %v3772_v30  ;;  %v420_v36 = vsel %vm153_vm8, 1, %v3772_v30  ;;  %vm161_vm10 = vcmp.eq.s32.totalorder %v3950_v26, 9 }
   0xf   :  { %3430 = vmatmul.mubr.msk.f32.gmra.mrb[2].mxu0 %vm5003_vm0, %v3927_v7  ;;  %3629 = vmatprep.subr.bf16.mxu1 %v3628_v10  ;;  %v446_v34 = vrot.slane %v421_v31, %v3953_v28  ;;  %v438_v35 = vrot.slane %v419_v32, %v3953_v28  ;;  %v442_v37 = vrot.slane %v420_v36, %v3953_v28  ;;  %vm162_vm11 = vcmp.eq.s32.totalorder %v3950_v26, 10 }
  0x10   :  { %v427_v39 = vsel %vm160_vm9, 1, %v3772_v30  ;;  %v428_v40 = vsel %vm161_vm10, 1, %v3772_v30  ;;  %v429_v45 = vsel %vm162_vm11, 1, %v3772_v30  ;;  %vm155_vm12 = vcmp.eq.s32.totalorder %v3950_v26, 3 }
  0x11   :  { %v470_v42 = vrot.slane %v427_v39, %v3953_v28  ;;  %v474_v43 = vrot.slane %v428_v40, %v3953_v28  ;;  %v478_v46 = vrot.slane %v429_v45, %v3953_v28  ;;  %v422_v47 = vsel %vm155_vm12, 1, %v3772_v30 }
  0x12   :  { %3631 = vmatpush3.bf16.msra.mxu1 %v3628_v10  ;;  %v450_v48 = vrot.slane %v422_v47, %v3953_v28  ;;  %vm163_vm13 = vcmp.eq.s32.totalorder %v3950_v26, 11  ;;  %vm156_vm14 = vcmp.eq.s32.totalorder %v3950_v26, 4  ;;  %vm164_vm15 = vcmp.eq.s32.totalorder %v3950_v26, 12 }
  0x13   :  { %v430_v49 = vsel %vm163_vm13, 1, %v3772_v30  ;;  %v3977_v50 = vsel %vm156_vm14, 1, %v3772_v30  ;;  %v3985_v54 = vsel %vm164_vm15, 1, %v3772_v30  ;;  %vm159_vm6 = vcmp.eq.s32.totalorder %v3950_v26, 7 }
  0x14   :  { %v482_v52 = vrot.slane %v430_v49, %v3953_v28  ;;  %v454_v53 = vrot.slane %v3977_v50, %v3953_v28  ;;  %v486_v55 = vrot.slane %v3985_v54, %v3953_v28  ;;  %vm167_vm7 = vcmp.eq.s32.totalorder %v3950_v26, 15 }
  0x15   :  { %v4009_v0 = vsel %vm159_vm6, 1, %v3772_v30  ;;  %v4016_v6 = vsel %vm167_vm7, 1, %v3772_v30  ;;  %v4022_v9 = vrot.slane %v3950_v26, %v3953_v28  ;;  %v3773_v10 = vmov 0.0  }
  0x16   :  { %v466_v5 = vrot.slane %v4009_v0, %v3953_v28  ;;  %v498_v8 = vrot.slane %v4016_v6, %v3953_v28  ;;  %vm4031_vm9 = vcmp.eq.s32.totalorder %v446_v34, 1  ;;  %vm4035_vm10 = vcmp.eq.s32.totalorder %v438_v35, 1 }
  0x17   :  { %vm91_vm8 = vcmp.eq.s32.totalorder %v3942_v24, %v4022_v9  ;;  %vm4039_vm11 = vcmp.eq.s32.totalorder %v442_v37, 1  ;;  %vm4051_vm12 = vcmp.eq.s32.totalorder %v470_v42, 1  ;;  %vm4058_vm13 = vcmp.eq.s32.totalorder %v474_v43, 1 }
  0x18   :  { %vm4065_vm14 = vcmp.eq.s32.totalorder %v478_v46, 1  ;;  %vm4072_vm15 = vcmp.eq.s32.totalorder %v450_v48, 1  ;;  %v5066_v37 = vmov 0  ;;  %v5068_v40 = vmov 0 }
  0x19   :  { %v5070_v43 = vmov 0  ;;  %v5072_v47 = vmov 0  ;;  %v5074_v50 = vmov 0  ;;  %v5076_v54 = vmov 0 }
  0x1a   :  { %vm4134_vm0 = vcmp.eq.s32.totalorder %v466_v5, 1 }
  0xde   :  { %v3428_v11 = vpop.f32.mrb[0].mxu0 }
  0xdf   :  { %v272_v12 = vmul.f32 0.2, %v3428_v11  ;;  %v248_v13 = vpop.f32.mrb[1].mxu0  ;;  %vm268_vm1 = vcmp.gt.f32.partialorder %v3428_v11, 0.0 }
  0xe0   :  { %v271_v14 = vmul.f32 0.2, %v248_v13  ;;  %vm267_vm3 = vcmp.gt.f32.partialorder %v248_v13, 0.0 }
  0xe1   :  { %v276_v19 = vsel %vm268_vm1, %v3428_v11, %v272_v12  ;;  %vm157_vm1 = vcmp.eq.s32.totalorder %v3950_v26, 5  ;;  %v4027_v11 = vsel %vm91_vm8, 1.0, %v3773_v10 }
  0xe2   :  { %v3431_v15 = vpop.f32.mrb[2].mxu0  ;;  %v275_v16 = vsel %vm267_vm3, %v248_v13, %v271_v14  ;;  %vm165_vm3 = vcmp.eq.s32.totalorder %v3950_v26, 13  ;;  %v424_v56 = vsel %vm157_vm1, 1, %v3772_v30  ;;  %vm4079_vm1 = vcmp.eq.s32.totalorder %v482_v52, 1 }
  0xe3   :  { %vm270_vm4 = vcmp.gt.f32.partialorder %v3431_v15, 0.0  ;;  %v274_v17 = vmul.f32 0.2, %v3431_v15  ;;  %v258_v18 = vpop.f32.mrb[3].mxu0  ;;  %3440 = vmatprep.mubr.msk.f32.mxu1 %vm5008_vm2, %v275_v16  ;;  %v3993_v57 = vsel %vm165_vm3, 1, %v3772_v30  ;;  %v458_v59 = vrot.slane %v424_v56, %v3953_v28 }
  0xe4   :  { %vm269_vm5 = vcmp.gt.f32.partialorder %v258_v18, 0.0  ;;  %v273_v20 = vmul.f32 0.2, %v258_v18  ;;  %3441 = vmatmul.mubr.msk.f32.vlgmr.msra.gmra.mrb[0].mxu1 %vm5008_vm2, %v276_v19  ;;  %v490_v60 = vrot.slane %v3993_v57, %v3953_v28  ;;  %v5067_v37 = vsel %vm4079_vm1, 4294967295, %v5066_v37 }
  0xe5   :  { %v278_v21 = vsel %vm270_vm4, %v3431_v15, %v274_v17  ;;  %vm158_vm4 = vcmp.eq.s32.totalorder %v3950_v26, 6  ;;  %v5056_v15 = vmov 0  ;;  %vm4086_vm3 = vcmp.eq.s32.totalorder %v454_v53, 1 }
  0xe6   :  { %v277_v22 = vsel %vm269_vm5, %v258_v18, %v273_v20  ;;  %v4000_v61 = vsel %vm158_vm4, 1, %v3772_v30  ;;  %vm166_vm5 = vcmp.eq.s32.totalorder %v3950_v26, 14  ;;  %v5057_v15 = vsel %vm4039_vm11, 4294967295, %v5056_v15 }
  0xe7   :  { %3443 = vmatprep.mubr.msk.f32.mxu1 %vm5008_vm2, %v277_v22  ;;  %v462_v62 = vrot.slane %v4000_v61, %v3953_v28  ;;  %v4007_v63 = vsel %vm166_vm5, 1, %v3772_v30  ;;  %v5069_v40 = vsel %vm4086_vm3, 4294967295, %v5068_v40  ;;  %vm4093_vm4 = vcmp.eq.s32.totalorder %v486_v55, 1 }
  0xe8   :  { %3444 = vmatmul.mubr.msk.f32.gmra.mrb[2].mxu1 %vm5008_vm2, %v278_v21  ;;  %v494_v4 = vrot.slane %v4007_v63, %v3953_v28  ;;  %v5071_v43 = vsel %vm4093_vm4, 4294967295, %v5070_v43  ;;  %vm4100_vm5 = vcmp.eq.s32.totalorder %v458_v59, 1  ;;  %vm4107_vm6 = vcmp.eq.s32.totalorder %v490_v60, 1 }
  0xe9   :  { %3464 = vmatprep.mubr.msk.f32.mxu1 %vm5008_vm2, %v4027_v11  ;;  %v5073_v47 = vsel %vm4100_vm5, 4294967295, %v5072_v47  ;;  %v5075_v50 = vsel %vm4107_vm6, 4294967295, %v5074_v50  ;;  %vm4117_vm7 = vcmp.eq.s32.totalorder %v462_v62, 1  ;;  %v5078_v57 = vmov 0 }
  0xea   :  { %v5077_v54 = vsel %vm4117_vm7, 4294967295, %v5076_v54  ;;  %vm4124_vm8 = vcmp.eq.s32.totalorder %v494_v4, 1  ;;  %v5080_v61 = vmov 0  ;;  %v5082_v4 = vmov 0 }
  0xeb   :  { %v5079_v57 = vsel %vm4124_vm8, 4294967295, %v5078_v57  ;;  %v5081_v61 = vsel %vm4134_vm0, 4294967295, %v5080_v61 }
 0x1b7   :  { %v3442_v27 = vpop.f32.mrb[0].mxu1 }
 0x1b8   :  { %v368_v29 = vpop.f32.mrb[1].mxu1  ;;  %v3969_v44 = vadd.f32 %v3442_v27, %v3240_v25 }
 0x1b9   :  { %v3958_v33 = vadd.f32 %v3240_v25, %v368_v29 }
 0x1bb   :  { %387 = vxpose.xlu0.b32.start [1/4] (short) (narrow) %v3958_v33, 8  ;;  %v3445_v38 = vpop.f32.mrb[2].mxu1 }
 0x1bc   :  { %v378_v41 = vpop.f32.mrb[3].mxu1  ;;  %v3995_v58 = vadd.f32 %v3445_v38, %v3240_v25 }
 0x1bd   :  { %v3980_v51 = vadd.f32 %v3240_v25, %v378_v41 }
 0x1bf   :  { %388 = vxpose.xlu0.b32.cont [2/4] (short) (narrow) %v3969_v44, 8 }
 0x1c3   :  { %389 = vxpose.xlu0.b32.cont [3/4] (short) (narrow) %v3980_v51, 8 }
 0x1c7   :  { %390 = vxpose.xlu0.b32.end [4/4] (short) (narrow) %v3995_v58, 8 }
 0x23b   :  { %v403_v14 = vpop.trf.xlu0 }
 0x23c   :  { %v517_v16 = vsel %vm4031_vm9, %v403_v14, -1e+30  ;;  %v515_v17 = vsel %vm4035_vm10, %v403_v14, -1e+30  ;;  %v516_v20 = vsel %vm4039_vm11, %v403_v14, -1e+30 }
 0x23d   :  { %v537_v18 = vsel %vm5008_vm2, %v517_v16, -inf  ;;  %v531_v19 = vsel %vm5008_vm2, %v515_v17, -inf  ;;  %v534_v22 = vsel %vm5008_vm2, %v516_v20, -inf  ;;  %v523_v25 = vsel %vm4051_vm12, %v403_v14, -1e+30 }
 0x23e   :  { %538 = vmax.xlane.f32.xlu0 %v537_v18  ;;  %532 = vmax.xlane.f32.xlu1 %v531_v19  ;;  %v555_v27 = vsel %vm5008_vm2, %v523_v25, -inf  ;;  %v524_v29 = vsel %vm4058_vm13, %v403_v14, -1e+30  ;;  %v525_v32 = vsel %vm4065_vm14, %v403_v14, -1e+30  ;;  %v4153_v17 = vadd.s32 8, %v3942_v24 }
 0x23f   :  { %v558_v31 = vsel %vm5008_vm2, %v524_v29, -inf  ;;  %v561_v35 = vsel %vm5008_vm2, %v525_v32, -inf  ;;  %v518_v36 = vsel %vm4072_vm15, %v403_v14, -1e+30  ;;  %v526_v39 = vsel %vm4079_vm1, %v403_v14, -1e+30 }
 0x240   :  { %v540_v38 = vsel %vm5008_vm2, %v518_v36, -inf  ;;  %v564_v41 = vsel %vm5008_vm2, %v526_v39, -inf  ;;  %v519_v42 = vsel %vm4086_vm3, %v403_v14, -1e+30  ;;  %v527_v46 = vsel %vm4093_vm4, %v403_v14, -1e+30 }
 0x241   :  { %v543_v45 = vsel %vm5008_vm2, %v519_v42, -inf  ;;  %v567_v48 = vsel %vm5008_vm2, %v527_v46, -inf  ;;  %v520_v49 = vsel %vm4100_vm5, %v403_v14, -1e+30  ;;  %v528_v53 = vsel %vm4107_vm6, %v403_v14, -1e+30 }
 0x242   :  { %535 = vmax.xlane.f32.xlu1 %v534_v22  ;;  %v546_v52 = vsel %vm5008_vm2, %v520_v49, -inf  ;;  %v570_v55 = vsel %vm5008_vm2, %v528_v53, -inf  ;;  %v521_v56 = vsel %vm4117_vm7, %v403_v14, -1e+30  ;;  %v529_v60 = vsel %vm4124_vm8, %v403_v14, -1e+30 }
 0x243   :  { %v549_v59 = vsel %vm5008_vm2, %v521_v56, -inf  ;;  %v573_v62 = vsel %vm5008_vm2, %v529_v60, -inf  ;;  %v522_v63 = vsel %vm4134_vm0, %v403_v14, -1e+30  ;;  %vm4144_vm7 = vcmp.eq.s32.totalorder %v498_v8, 1 }
 0x244   :  { %v5083_v4 = vsel %vm4144_vm7, 4294967295, %v5082_v4  ;;  %v552_v16 = vsel %vm5008_vm2, %v522_v63, -inf  ;;  %v530_v0 = vsel %vm4144_vm7, %v403_v14, -1e+30  ;;  %vm92_vm0 = vcmp.eq.s32.totalorder %v4153_v17, %v4022_v9 }
 0x245   :  { %v576_v5 = vsel %vm5008_vm2, %v530_v0, -inf  ;;  %v4159_v28 = vsel %vm92_vm0, 1.0, %v3773_v10  ;;  %v4163_v9 = vand.u32 127, %v84_v23  ;;  %vm5019_vm0 = vcmask 1041409  }
 0x246   :  { %556 = vmax.xlane.f32.xlu1 %v555_v27  ;;  %5084 = vst [vmem:[#allocation2_spill] sm:$0xff] %v4159_v28  ;;  %vm5085_vm7 = vcmask 1042434   ;;  %vm5087_vm8 = vcmask 1043459   ;;  %vm5024_vm4 = vcmask 1046534   ;;  %vm5023_vm3 = vcmask 1047559  }
 0x247   :  { %vm5086_vm6 = vmmov %vm5085_vm7 }
 0x248   :  { %vm5088_vm5 = vmmov %vm5087_vm8 }
 0x24a   :  { %559 = vmax.xlane.f32.xlu1 %v558_v31 }
 0x24e   :  { %562 = vmax.xlane.f32.xlu1 %v561_v35  ;;  %v4167_v35 = vsub.s32 %v4163_v9, %v3942_v24 }
 0x252   :  { %541 = vmax.xlane.f32.xlu1 %v540_v38 }
 0x256   :  { %565 = vmax.xlane.f32.xlu1 %v564_v41 }
 0x25a   :  { %544 = vmax.xlane.f32.xlu1 %v543_v45 }
 0x25e   :  { %568 = vmax.xlane.f32.xlu1 %v567_v48 }
 0x262   :  { %547 = vmax.xlane.f32.xlu1 %v546_v52 }
 0x266   :  { %571 = vmax.xlane.f32.xlu1 %v570_v55 }
 0x26a   :  { %550 = vmax.xlane.f32.xlu1 %v549_v59 }
 0x26e   :  { %574 = vmax.xlane.f32.xlu1 %v573_v62 }
 0x272   :  { %553 = vmax.xlane.f32.xlu1 %v552_v16 }
 0x276   :  { %577 = vmax.xlane.f32.xlu1 %v576_v5 }
 0x2a9   :  { %103 = vxpose.xlu1.b32.start [1/2] (short) (narrow) %v4027_v11, 32 }
 0x2ad   :  { %104 = vxpose.xlu1.b32.end [2/2] (short) (narrow) %v4159_v28, 32 }
 0x2cb   :  { %v533_v6 = vpop.xlane.xlu1 %532  ;;  %v539_v39 = vpop.xlane.xlu0 %538 }
 0x2cc   :  { %v600_v41 = vrot.slane %v533_v6, %v4167_v35  ;;  %v608_v52 = vrot.slane %v539_v39, %v4167_v35 }
 0x2cf   :  { %v536_v8 = vpop.xlane.xlu1 %535 }
 0x2d0   :  { %v604_v36 = vrot.slane %v536_v8, %v4167_v35 }
 0x2d2   :  { %v662_v23 = vsel %vm5019_vm0, %v604_v36, %v600_v41 }
 0x2d3   :  { %v557_v18 = vpop.xlane.xlu1 %556  ;;  %v664_v16 = vsel %vm5086_vm6, %v608_v52, %v662_v23 }
 0x2d4   :  { %v632_v46 = vrot.slane %v557_v18, %v4167_v35 }
 0x2d7   :  { %v560_v14 = vpop.xlane.xlu1 %559 }
 0x2d8   :  { %v636_v42 = vrot.slane %v560_v14, %v4167_v35 }
 0x2da   :  { %v675_v59 = vsel %vm5019_vm0, %v636_v42, %v632_v46  ;;  %vm5089_vm0 = vcmask 1044484  }
 0x2db   :  { %v563_v19 = vpop.xlane.xlu1 %562  ;;  %vm5090_vm2 = vmmov %vm5089_vm0 }
 0x2dc   :  { %v640_v45 = vrot.slane %v563_v19, %v4167_v35 }
 0x2de   :  { %v676_v63 = vsel %vm5085_vm7, %v640_v45, %v675_v59  ;;  %vm5091_vm7 = vcmask 1045509  }
 0x2df   :  { %v542_v20 = vpop.xlane.xlu1 %541  ;;  %vm5092_vm6 = vmmov %vm5091_vm7 }
 0x2e0   :  { %v612_v48 = vrot.slane %v542_v20, %v4167_v35 }
 0x2e2   :  { %v666_v6 = vsel %vm5087_vm8, %v612_v48, %v664_v16 }
 0x2e3   :  { %v566_v22 = vpop.xlane.xlu1 %565 }
 0x2e4   :  { %v644_v49 = vrot.slane %v566_v22, %v4167_v35 }
 0x2e6   :  { %v677_v8 = vsel %vm5088_vm5, %v644_v49, %v676_v63  ;;  %vm5094_vm5 = vcmask 261120  }
 0x2e7   :  { %v545_v25 = vpop.xlane.xlu1 %544 }
 0x2e8   :  { %v616_v53 = vrot.slane %v545_v25, %v4167_v35 }
 0x2ea   :  { %v668_v14 = vsel %vm5089_vm0, %v616_v53, %v666_v6  ;;  %vm5097_vm0 = vmmov %vm5094_vm5 }
 0x2eb   :  { %v569_v27 = vpop.xlane.xlu1 %568 }
 0x2ec   :  { %v648_v55 = vrot.slane %v569_v27, %v4167_v35 }
 0x2ee   :  { %v678_v19 = vsel %vm5090_vm2, %v648_v55, %v677_v8  ;;  %vm5025_vm2 = vcmask 130048  }
 0x2ef   :  { %v548_v29 = vpop.xlane.xlu1 %547 }
 0x2f0   :  { %v620_v60 = vrot.slane %v548_v29, %v4167_v35 }
 0x2f2   :  { %v670_v22 = vsel %vm5091_vm7, %v620_v60, %v668_v14 }
 0x2f3   :  { %v572_v31 = vpop.xlane.xlu1 %571 }
 0x2f4   :  { %v652_v62 = vrot.slane %v572_v31, %v4167_v35 }
 0x2f6   :  { %v679_v25 = vsel %vm5092_vm6, %v652_v62, %v678_v19  ;;  %vm5098_vm6 = vmmov %vm5097_vm0 }
 0x2f7   :  { %v551_v32 = vpop.xlane.xlu1 %550 }
 0x2f8   :  { %v624_v0 = vrot.slane %v551_v32, %v4167_v35 }
 0x2fa   :  { %v672_v29 = vsel %vm5024_vm4, %v624_v0, %v670_v22 }
 0x2fb   :  { %v575_v38 = vpop.xlane.xlu1 %574 }
 0x2fc   :  { %v656_v5 = vrot.slane %v575_v38, %v4167_v35 }
 0x2fe   :  { %v680_v31 = vsel %vm5024_vm4, %v656_v5, %v679_v25 }
 0x2ff   :  { %v554_v56 = vpop.xlane.xlu1 %553 }
 0x300   :  { %v628_v18 = vrot.slane %v554_v56, %v4167_v35 }
 0x302   :  { %v674_v32 = vsel %vm5023_vm3, %v628_v18, %v672_v29  ;;  %v3235_v29 = vld [vmem:[%s5095_s0] ss:$0 sm:$0xff] }
 0x303   :  { %v578_v20 = vpop.xlane.xlu1 %577  ;;  %vm99_vm8 = vcmp.eq.s32.totalorder %v3942_v24, %v3235_v29  ;;  %vm100_vm7 = vcmp.eq.s32.totalorder %v4153_v17, %v3235_v29 }
 0x304   :  { %v660_v27 = vrot.slane %v578_v20, %v4167_v35 }
 0x306   :  { %v681_v36 = vsel %vm5023_vm3, %v660_v27, %v680_v31  ;;  %v4266_v31 = vsel %vm99_vm8, 1.0, %v3773_v10  ;;  %vm5102_vm8 = vmmov %vm5097_vm0  ;;  %vm5110_vm3 = vcmask 261120  }
 0x307   :  { %v3632_v38 = vpack.c.bf16 %v681_v36, %v674_v32  ;;  %5096 = vst [vmem:[#allocation3_spill] sm:$0xff] %v4266_v31  ;;  %v136_v32 = vsel %vm5098_vm6, %v4266_v31, 0.0  ;;  %v4274_v36 = vsel %vm100_vm7, 1.0, %v3773_v10  ;;  %vm5111_vm4 = vmmov %vm5110_vm3 }
 0x308   :  { %5099 = vst [vmem:[#allocation4_spill] sm:$0xff] %v4274_v36  ;;  %137 = vadd.xlane.f32.xlu0 %v136_v32 }
 0x309   :  { %3633 = vmatprep.subr.bf16.mxu0 %v3632_v38 }
 0x30a   :  { %3635 = vmatpush3.bf16.msra.mxu0 %v3632_v38 }
 0x329   :  { %v4199_v39 = vpop.trf.xlu1 }
 0x32a   :  { %3450 = vmatprep.mubr.msk.f32.mxu0 %vm5025_vm2, %v4199_v39 }
 0x32d   :  { %v4203_v41 = vpop.trf.xlu1 }
 0x32e   :  { %3451 = vmatmul.mubr.msk.f32.vlgmr.msra.gmra.mrb[4].mxu0 %vm5025_vm2, %v4203_v41 }
 0x331   :  { %v4207_v42 = vpop.trf.xlu1 }
 0x332   :  { %3453 = vmatprep.mubr.msk.f32.mxu0 %vm5025_vm2, %v4207_v42 }
 0x335   :  { %v4211_v45 = vpop.trf.xlu1 }
 0x336   :  { %3454 = vmatmul.mubr.msk.f32.gmra.mrb[6].mxu0 %vm5025_vm2, %v4211_v45 }
 0x337   :  { %3471 = vmatprep.mubr.msk.f32.mxu0 %vm5025_vm2, %v4199_v39 }
 0x401   :  { %v3452_v23 = vpop.f32.mrb[4].mxu0 }
 0x402   :  { %v783_v46 = vsub.f32 %v3969_v44, %v3452_v23  ;;  %v763_v48 = vpop.f32.mrb[5].mxu0 }
 0x403   :  { %v782_v49 = vsub.f32 %v3958_v33, %v763_v48 }
 0x404   :  { %v788_v52 = vmul.f32 1.442695, %v783_v46 }
 0x405   :  { %v786_v53 = vmul.f32 1.442695, %v782_v49 }
 0x406   :  { %3726 = vpow2.f32 %v788_v52 }
 0x407   :  { %3728 = vpow2.f32 %v786_v53 }
 0x409   :  { %v3455_v55 = vpop.f32.mrb[6].mxu0 }
 0x40a   :  { %v785_v56 = vsub.f32 %v3995_v58, %v3455_v55  ;;  %v773_v59 = vpop.f32.mrb[7].mxu0  ;;  %v4230_v58 = vld [vmem:[%s5093_s5] sm:$0xff] }
 0x40b   :  { %v784_v60 = vsub.f32 %v3980_v51, %v773_v59  ;;  %v4235_v51 = vld [vmem:[%s5093_s5 + $0x8] sm:$0xff] }
 0x40c   :  { %v792_v62 = vmul.f32 1.442695, %v785_v56  ;;  %v3648_v8 = vpack.c.bf16 %v4235_v51, %v4230_v58 }
 0x40d   :  { %v790_v63 = vmul.f32 1.442695, %v784_v60 }
 0x40e   :  { %3730 = vpow2.f32 %v792_v62 }
 0x40f   :  { %3732 = vpow2.f32 %v790_v63 }
 0x410   :  { %v4221_v16 = vpop.eup %3726 }
 0x411   :  { %v4223_v44 = vpop.eup %3728 }
 0x412   :  { %v3636_v33 = vpack.c.bf16 %v4221_v16, %v4223_v44 }
 0x414   :  { %3637 = vmatprep.subr.bf16.mxu1 %v3636_v33 }
 0x415   :  { %3639 = vmatpush3.bf16.msra.mxu1 %v3636_v33 }
 0x418   :  { %v4237_v0 = vpop.eup %3730 }
 0x419   :  { %v4239_v5 = vpop.eup %3732 }
 0x41a   :  { %v3640_v6 = vpack.c.bf16 %v4237_v0, %v4239_v5 }
 0x41c   :  { %3641 = vmatprep.subr.bf16.mxu1 %v3640_v6 }
 0x41d   :  { %3643 = vmatpush3.bf16.msra.mxu1 %v3640_v6 }
 0x41e   :  { %3649 = vmatprep.subr.bf16.mxu1 %v3648_v8 }
 0x420   :  { %3465 = vmatmul.mubr.msk.f32.vlgmr.msra.gmra.mrb[4].mxu1 %vm5094_vm5, %v4159_v28  ;;  %vm5100_vm5 = vmmov %vm5097_vm0 }
 0x421   :  { %3651 = vmatpush3.bf16.msra.mxu1 %v3648_v8  ;;  %3481 = vmatprep.mubr.msk.f32.mxu1 %vm5025_vm2, %v4199_v39  ;;  %v139_v38 = vsel %vm5100_vm5, %v4274_v36, 0.0 }
 0x422   :  { %140 = vadd.xlane.f32.xlu0 %v139_v38 }
 0x424   :  { %3482 = vmatmul.mubr.msk.f32.vlgmr.msra.gmra.mrb[6].mxu1 %vm5025_vm2, %v4203_v41 }
 0x425   :  { %3484 = vmatprep.mubr.msk.f32.mxu1 %vm5025_vm2, %v4207_v42 }
 0x428   :  { %3485 = vmatmul.mubr.msk.f32.gmra.mrb[8].mxu1 %vm5025_vm2, %v4211_v45 }
 0x429   :  { %3495 = vmatprep.mubr.msk.f32.mxu1 %vm5097_vm0, %v4266_v31  ;;  %vm5103_vm0 = vcmask 64512  }
 0x42a   :  { %vm5104_vm7 = vmmov %vm5103_vm0 }
 0x42b   :  { %vm5107_vm6 = vmmov %vm5103_vm0 }
 0x42c   :  { %vm5108_vm5 = vmmov %vm5103_vm0 }
 0x4f3   :  { %v3466_v18 = vpop.f32.mrb[4].mxu1 }
 0x4f4   :  { %v866_v14 = vpop.f32.mrb[5].mxu1 }
 0x4f5   :  { %v3644_v19 = vpack.c.bf16 %v3466_v18, %v866_v14 }
 0x4f7   :  { %3645 = vmatprep.subr.bf16.mxu0 %v3644_v19  ;;  %v3483_v20 = vpop.f32.mrb[6].mxu1 }
 0x4f8   :  { %3647 = vmatpush3.bf16.msra.mxu0 %v3644_v19  ;;  %v1046_v22 = vpop.f32.mrb[7].mxu1 }
 0x4fb   :  { %3472 = vmatmul.mubr.msk.f32.vlgmr.msra.gmra.mrb[8].mxu0 %vm5025_vm2, %v4203_v41  ;;  %v3486_v25 = vpop.f32.mrb[8].mxu1 }
 0x4fc   :  { %3474 = vmatprep.mubr.msk.f32.mxu0 %vm5025_vm2, %v4207_v42  ;;  %v1056_v27 = vpop.f32.mrb[9].mxu1 }
 0x4ff   :  { %3475 = vmatmul.mubr.msk.f32.gmra.mrb[10].mxu0 %vm5025_vm2, %v4211_v45  ;;  %vm5113_vm2 = vmmov %vm5108_vm5 }
 0x500   :  { %vm5115_vm1 = vmmov %vm5113_vm2 }
 0x5ce   :  { %v3473_v23 = vpop.f32.mrb[8].mxu0 }
 0x5cf   :  { %v947_v46 = vadd.f32 1e-16, %v3473_v23  ;;  %v941_v48 = vpop.f32.mrb[9].mxu0 }
 0x5d0   :  { %v942_v49 = vadd.f32 1e-16, %v941_v48 }
 0x5d1   :  { %3734 = vrcp.f32 %v947_v46 }
 0x5d2   :  { %3736 = vrcp.f32 %v942_v49  ;;  %v3476_v52 = vpop.f32.mrb[10].mxu0 }
 0x5d3   :  { %v957_v53 = vadd.f32 1e-16, %v3476_v52  ;;  %v951_v17 = vpop.f32.mrb[11].mxu0 }
 0x5d4   :  { %v952_v55 = vadd.f32 1e-16, %v951_v17 }
 0x5d5   :  { %3738 = vrcp.f32 %v957_v53 }
 0x5d6   :  { %3740 = vrcp.f32 %v952_v55 }
 0x5db   :  { %v3735_v56 = vpop.eup %3734 }
 0x5dc   :  { %v3737_v10 = vpop.eup %3736  ;;  %v965_v59 = vmul.f32 %v3735_v56, %v947_v46 }
 0x5dd   :  { %v964_v60 = vmul.f32 %v3737_v10, %v942_v49 }
 0x5de   :  { %v969_v62 = vsub.f32 2.0, %v965_v59 }
 0x5df   :  { %v3739_v63 = vpop.eup %3738  ;;  %v968_v33 = vsub.f32 2.0, %v964_v60 }
 0x5e0   :  { %v3741_v6 = vpop.eup %3740  ;;  %v973_v8 = vmul.f32 %v3735_v56, %v969_v62  ;;  %v967_v18 = vmul.f32 %v3739_v63, %v957_v53  ;;  %v1515_v62 = vld [vmem:[%s4988_s14] sm:$0xff] }
 0x5e1   :  { %v972_v14 = vmul.f32 %v3737_v10, %v968_v33  ;;  %v966_v19 = vmul.f32 %v3741_v6, %v952_v55  ;;  %v1429_v10 = vld [vmem:[%s4987_s13] sm:$0xff] }
 0x5e2   :  { %v977_v29 = vmul.f32 %v4221_v16, %v973_v8  ;;  %v971_v32 = vsub.f32 2.0, %v967_v18  ;;  %v1152_v16 = vld [vmem:[%s5101_s26] sm:$0xff] }
 0x5e3   :  { %v976_v38 = vmul.f32 %v4223_v44, %v972_v14  ;;  %v970_v23 = vsub.f32 2.0, %v966_v19  ;;  %v80_v44 = vld [vmem:[%s4984_s2] sm:$0xff] }
 0x5e4   :  { %v975_v48 = vmul.f32 %v3739_v63, %v971_v32  ;;  %v1066_v52 = vmul.f32 %v3483_v20, %v977_v29  ;;  %v1241_v20 = vld [vmem:[%s4985_s9 + $0x8] sm:$0xff]  ;;  %v138_v63 = vpop.xlane.xlu0 %137 }
 0x5e5   :  { %v974_v17 = vmul.f32 %v3741_v6, %v970_v23  ;;  %v1065_v31 = vmul.f32 %v1046_v22, %v976_v38  ;;  %v1332_v22 = vld [vmem:[%s4986_s11] sm:$0xff]  ;;  %v142_v6 = vmax.f32 %v138_v63, 1.0 }
 0x5e6   :  { %v979_v46 = vmul.f32 %v4237_v0, %v975_v48  ;;  %v81_v0 = vld [vmem:[%s4984_s2 + $0x8] sm:$0xff] }
 0x5e7   :  { %v978_v49 = vmul.f32 %v4239_v5, %v974_v17  ;;  %v3652_v59 = vpack.c.bf16 %v1066_v52, %v1065_v31  ;;  %v1240_v5 = vld [vmem:[%s4985_s9] sm:$0xff]  ;;  %v1243_v31 = vld [vmem:[%s4985_s9 + $0x18] sm:$0xff]  ;;  %3742 = vrcp.f32 %v142_v6 }
 0x5e8   :  { %v1068_v60 = vmul.f32 %v3486_v25, %v979_v46  ;;  %v3660_v25 = vpack.c.bf16 %v1241_v20, %v1240_v5  ;;  %v141_v33 = vpop.xlane.xlu0 %140  ;;  %v3266_v5 = vld [vmem:[%s4991_s12] ss:$0 sm:$0xff] }
 0x5e9   :  { %3653 = vmatprep.subr.bf16.mxu1 %v3652_v59  ;;  %v1067_v53 = vmul.f32 %v1056_v27, %v978_v49  ;;  %v1242_v27 = vld [vmem:[%s4985_s9 + $0x10] sm:$0xff]  ;;  %v143_v8 = vmax.f32 %v141_v33, 1.0 }
 0x5ea   :  { %3655 = vmatpush3.bf16.msra.mxu1 %v3652_v59  ;;  %3661 = vmatprep.subr.bf16.mxu0 %v3660_v25  ;;  %v3664_v56 = vpack.c.bf16 %v1243_v31, %v1242_v27 }
 0x5eb   :  { %v3656_v55 = vpack.c.bf16 %v1068_v60, %v1067_v53  ;;  %3663 = vmatpush3.bf16.msra.mxu0 %v3660_v25  ;;  %3744 = vrcp.f32 %v143_v8 }
 0x5ec   :  { %3665 = vmatprep.subr.bf16.mxu0 %v3664_v56 }
 0x5ed   :  { %3657 = vmatprep.subr.bf16.mxu1 %v3656_v55 }
 0x5ee   :  { %3659 = vmatpush3.bf16.msra.mxu1 %v3656_v55 }
 0x5ef   :  { %3498 = vmatprep.subr.mxu1 %v1152_v16  ;;  %3667 = vmatpush3.bf16.msra.mxu0 %v3664_v56 }
 0x5f0   :  { %3524 = vmatprep.subr.mxu0 %v1515_v62 }
 0x5f1   :  { %3496 = vmatmul.mubr.msk.f32.vlgmr.msra.gmra.mrb[10].mxu1 %vm5102_vm8, %v4274_v36  ;;  %v3743_v18 = vpop.eup %3742 }
 0x5f2   :  { %3499 = vmatpush3.msra.mxu1 %v1152_v16  ;;  %3500 = vmatprep.mubr.msk.f32.mxu1 %vm5103_vm0, %v80_v44  ;;  %v146_v19 = vmul.f32 %v3743_v18, %v142_v6 }
 0x5f3   :  { %3514 = vmatprep.subr.mxu1 %v1332_v22 }
 0x5f4   :  { %v148_v32 = vsub.f32 2.0, %v146_v19 }
 0x5f5   :  { %3501 = vmatmul.mubr.msk.f32.vlgmr.msra.gmra.mrb[12].mxu1 %vm5104_vm7, %v81_v0  ;;  %v3745_v14 = vpop.eup %3744  ;;  %vm5109_vm7 = vmmov %vm5108_vm5 }
 0x5f6   :  { %3515 = vmatpush3.msra.mxu1 %v1332_v22  ;;  %v147_v29 = vmul.f32 %v3745_v14, %v143_v8  ;;  %v4316_v23 = vmul.f32 %v3743_v18, %v148_v32 }
 0x5f7   :  { %3519 = vmatprep.subr.mxu1 %v1429_v10 }
 0x5f8   :  { %v149_v38 = vsub.f32 2.0, %v147_v29  ;;  %5105 = vst [vmem:[#allocation5_spill] sm:$0xff] %v4316_v23 }
 0x5fa   :  { %v4318_v48 = vmul.f32 %v3745_v14, %v149_v38 }
 0x5fc   :  { %5106 = vst [vmem:[#allocation6_spill] sm:$0xff] %v4318_v48 }
 0x6c4   :  { %v3497_v52 = vpop.f32.mrb[10].mxu1 }
 0x6c5   :  { %v1141_v17 = vpop.f32.mrb[11].mxu1  ;;  %v1151_v49 = vmul.f32 %v3497_v52, %v4318_v48 }
 0x6c6   :  { %v1150_v46 = vmul.f32 %v1141_v17, %v4316_v23 }
 0x6c8   :  { %v3502_v59 = vpop.f32.mrb[12].mxu1  ;;  %3516 = vmatprep.mubr.msk.f32.mxu1 %vm5107_vm6, %v1150_v46  ;;  %vm5112_vm6 = vmmov %vm5108_vm5 }
 0x6c9   :  { %v1237_v60 = vmul.f32 0.2, %v3502_v59  ;;  %v1225_v53 = vpop.f32.mrb[13].mxu1  ;;  %3517 = vmatmul.mubr.msk.f32.vlgmr.msra.gmra.mrb[14].mxu1 %vm5108_vm5, %v1151_v49  ;;  %vm1235_vm8 = vcmp.gt.f32.partialorder %v3502_v59, 0.0  ;;  %vm5114_vm5 = vmmov %vm5113_vm2  ;;  %v3275_v49 = vld [vmem:[%s4992_s16] ss:$0 sm:$0xff] }
 0x6ca   :  { %vm1234_vm0 = vcmp.gt.f32.partialorder %v1225_v53, 0.0  ;;  %v1236_v55 = vmul.f32 0.2, %v1225_v53  ;;  %3520 = vmatpush3.msra.mxu1 %v1429_v10  ;;  %3521 = vmatprep.mubr.msk.f32.mxu1 %vm5109_vm7, %v4230_v58  ;;  %vm5028_vm7 = vcmask 31744  }
 0x6cb   :  { %v1239_v44 = vsel %vm1235_vm8, %v3502_v59, %v1237_v60 }
 0x6cc   :  { %v1238_v16 = vsel %vm1234_vm0, %v1225_v53, %v1236_v55  ;;  %vm5116_vm0 = vmmov %vm5115_vm1 }
 0x6cd   :  { %3511 = vmatprep.mubr.msk.f32.mxu0 %vm5110_vm3, %v1238_v16  ;;  %vm5117_vm3 = vcmask 130048  }
 0x6ce   :  { %3512 = vmatmul.mubr.msk.f32.vlgmr.msra.gmra.mrb[12].mxu0 %vm5111_vm4, %v1239_v44  ;;  %vm5029_vm4 = vcmask 1043456  }
 0x6cf   :  { %3525 = vmatpush3.msra.mxu0 %v1515_v62  ;;  %3526 = vmatprep.mubr.msk.f32.mxu0 %vm5112_vm6, %v3900_v1  ;;  %v1613_v1 = vld [vmem:[%s4989_s15] sm:$0xf] }
 0x6d0   :  { %3532 = vmatprep.subr.msk.mxu1 %vm5029_vm4, %v1613_v1 }
 0x6d1   :  { %3522 = vmatmul.mubr.msk.f32.vlgmr.msra.gmra.mrb[14].mxu1 %vm5113_vm2, %v4235_v51 }
 0x6d2   :  { %3527 = vmatmul.mubr.msk.f32.vlgmr.msra.gmra.mrb[14].mxu0 %vm5114_vm5, %v3905_v2  ;;  %3533 = vmatpush3.msk.msra.mxu1 %vm5029_vm4, %v1613_v1  ;;  %v3263_v2 = vld [vmem:[%s4990_s10] ss:$0 sm:$0xff] }
 0x6d3   :  { %3529 = vmatprep.mubr.msk.f32.mxu0 %vm5115_vm1, %v3912_v3 }
 0x6d6   :  { %3530 = vmatmul.mubr.msk.f32.gmra.mrb[16].mxu0 %vm5116_vm0, %v3927_v7 }
 0x6d7   :  { %3544 = vmatprep.mubr.msk.f32.mxu0 %vm5117_vm3, %v4199_v39  ;;  %vm5118_vm3 = vcmask 261120  }
 0x7a1   :  { %v3513_v3 = vpop.f32.mrb[12].mxu0 }
 0x7a2   :  { %v1329_v58 = vadd.f32 %v3513_v3, %v3263_v2  ;;  %v1323_v51 = vpop.f32.mrb[13].mxu0 }
 0x7a3   :  { %v1324_v7 = vadd.f32 %v3263_v2, %v1323_v51 }
 0x7a4   :  { %vm1422_vm1 = vcmp.gt.f32.partialorder %v1329_v58, 0.0  ;;  %v1424_v0 = vmul.f32 0.01, %v1329_v58  ;;  %v3523_v20 = vpop.f32.mrb[14].mxu1 }
 0x7a5   :  { %vm1421_vm2 = vcmp.gt.f32.partialorder %v1324_v7, 0.0  ;;  %v1423_v22 = vmul.f32 0.01, %v1324_v7  ;;  %v1502_v25 = vpop.f32.mrb[15].mxu1  ;;  %v3528_v27 = vpop.f32.mrb[14].mxu0 }
 0x7a6   :  { %v1426_v31 = vsel %vm1422_vm1, %v1329_v58, %v1424_v0  ;;  %vm1602_vm8 = vcmp.gt.f32.partialorder %v3528_v27, 0.0  ;;  %v1606_v56 = vmul.f32 0.2, %v3528_v27  ;;  %v1582_v10 = vpop.f32.mrb[15].mxu0  ;;  %vm5119_vm1 = vmmov %vm5118_vm3 }
 0x7a7   :  { %v3712_v62 = vadd.f32 %v3266_v5, %v1426_v31  ;;  %v1425_v63 = vsel %vm1421_vm2, %v1324_v7, %v1423_v22  ;;  %vm1601_vm6 = vcmp.gt.f32.partialorder %v1582_v10, 0.0  ;;  %v1605_v33 = vmul.f32 0.2, %v1582_v10  ;;  %vm5120_vm2 = vmmov %vm5119_vm1 }
 0x7a8   :  { %v3714_v6 = vadd.f32 %v3266_v5, %v1425_v63  ;;  %v1610_v29 = vsel %vm1602_vm8, %v3528_v27, %v1606_v56  ;;  %vm5121_vm8 = vmmov %vm5119_vm1 }
 0x7a9   :  { %v4351_v8 = vadd.f32 %v3712_v62, %v3523_v20  ;;  %v3531_v18 = vpop.f32.mrb[16].mxu0  ;;  %v1609_v14 = vsel %vm1601_vm6, %v1582_v10, %v1605_v33  ;;  %vm5122_vm6 = vmmov %vm5119_vm1 }
 0x7aa   :  { %v4353_v19 = vadd.f32 %v3714_v6, %v1502_v25  ;;  %vm1604_vm5 = vcmp.gt.f32.partialorder %v3531_v18, 0.0  ;;  %v1608_v32 = vmul.f32 0.2, %v3531_v18  ;;  %v1592_v38 = vpop.f32.mrb[17].mxu0  ;;  %3534 = vmatprep.mubr.msk.f32.mxu1 %vm5028_vm7, %v1609_v14 }
 0x7ab   :  { %vm1603_vm0 = vcmp.gt.f32.partialorder %v1592_v38, 0.0  ;;  %v1607_v52 = vmul.f32 0.2, %v1592_v38  ;;  %3535 = vmatmul.mubr.msk.f32.vlgmr.msra.gmra.mrb[16].mxu1 %vm5028_vm7, %v1610_v29 }
 0x7ac   :  { %v1612_v17 = vsel %vm1604_vm5, %v3531_v18, %v1608_v32  ;;  %vm5123_vm5 = vmmov %vm5119_vm1 }
 0x7ad   :  { %v1611_v46 = vsel %vm1603_vm0, %v1592_v38, %v1607_v52  ;;  %vm5124_vm0 = vmmov %vm5119_vm1 }
 0x7ae   :  { %3537 = vmatprep.mubr.msk.f32.mxu1 %vm5028_vm7, %v1611_v46 }
 0x7af   :  { %3538 = vmatmul.mubr.msk.f32.gmra.mrb[18].mxu1 %vm5028_vm7, %v1612_v17 }
 0x7b0   :  { %3558 = vmatprep.mubr.msk.f32.mxu1 %vm5118_vm3, %v4027_v11  ;;  %vm5125_vm3 = vmmov %vm5124_vm0 }
 0x87e   :  { %v3536_v59 = vpop.f32.mrb[16].mxu1 }
 0x87f   :  { %v1704_v60 = vpop.f32.mrb[17].mxu1  ;;  %v4367_v44 = vadd.f32 %v3536_v59, %v3275_v49 }
 0x880   :  { %v4364_v53 = vadd.f32 %v3275_v49, %v1704_v60 }
 0x882   :  { %v3539_v55 = vpop.f32.mrb[18].mxu1  ;;  %1723 = vxpose.xlu0.b32.start [1/4] (short) (narrow) %v4364_v53, 32 }
 0x883   :  { %v1714_v16 = vpop.f32.mrb[19].mxu1  ;;  %v4373_v11 = vadd.f32 %v3539_v55, %v3275_v49 }
 0x884   :  { %v4370_v1 = vadd.f32 %v3275_v49, %v1714_v16 }
 0x886   :  { %1724 = vxpose.xlu0.b32.cont [2/4] (short) (narrow) %v4367_v44, 32 }
 0x88a   :  { %1725 = vxpose.xlu0.b32.cont [3/4] (short) (narrow) %v4370_v1, 32 }
 0x88e   :  { %1726 = vxpose.xlu0.b32.end [4/4] (short) (narrow) %v4373_v11, 32 }
 0x902   :  { %v4376_v2 = vpop.trf.xlu0 }
 0x903   :  { %v1767_v3 = vsel %vm4072_vm15, %v4376_v2, -1e+30  ;;  %v1755_v58 = vsel %vm4035_vm10, %v4376_v2, -1e+30  ;;  %v1759_v0 = vsel %vm4039_vm11, %v4376_v2, -1e+30 }
 0x904   :  { %v1855_v51 = vsel %vm5119_vm1, %v1767_v3, -inf  ;;  %v1819_v7 = vsel %vm5120_vm2, %v1755_v58, -inf  ;;  %v1831_v25 = vsel %vm5121_vm8, %v1759_v0, -inf  ;;  %v1787_v31 = vsel %vm4051_vm12, %v4376_v2, -1e+30  ;;  %vm5126_vm1 = vmmov %vm5124_vm0 }
 0x905   :  { %1856 = vmax.xlane.f32.xlu0 %v1855_v51  ;;  %1820 = vmax.xlane.f32.xlu1 %v1819_v7  ;;  %v1915_v62 = vsel %vm5124_vm0, %v1787_v31, -inf  ;;  %v1791_v63 = vsel %vm4058_vm13, %v4376_v2, -1e+30  ;;  %v1763_v18 = vsel %vm4031_vm9, %v4376_v2, -1e+30  ;;  %vm5127_vm2 = vmmov %vm5124_vm0 }
 0x906   :  { %v4389_v5 = vpop.trf.xlu0  ;;  %v1927_v6 = vsel %vm5126_vm1, %v1791_v63, -inf  ;;  %v1843_v29 = vsel %vm5127_vm2, %v1763_v18, -inf  ;;  %vm5128_vm8 = vmmov %vm5124_vm0  ;;  %v1795_v38 = vsel %vm4065_vm14, %v4376_v2, -1e+30  ;;  %vm5133_vm2 = vnez %v5069_v40 }
 0x907   :  { %v1756_v20 = vsel %vm4035_vm10, %v4389_v5, -1e+30  ;;  %v1788_v22 = vsel %vm4051_vm12, %v4389_v5, -1e+30  ;;  %v1792_v10 = vsel %vm4058_vm13, %v4389_v5, -1e+30  ;;  %vm5140_vm7 = vmmov %vm5126_vm1 }
 0x908   :  { %v1822_v27 = vsel %vm5122_vm6, %v1756_v20, -inf  ;;  %v1918_v56 = vsel %vm5123_vm5, %v1788_v22, -inf  ;;  %v1930_v33 = vsel %vm5125_vm3, %v1792_v10, -inf  ;;  %v1764_v14 = vsel %vm4031_vm9, %v4389_v5, -1e+30  ;;  %vm5129_vm6 = vmmov %vm5124_vm0 }
 0x909   :  { %1832 = vmax.xlane.f32.xlu1 %v1831_v25  ;;  %1823 = vmax.xlane.f32.xlu0 %v1822_v27  ;;  %v1846_v32 = vsel %vm5128_vm8, %v1764_v14, -inf  ;;  %v1796_v52 = vsel %vm4065_vm14, %v4389_v5, -1e+30  ;;  %v1939_v17 = vsel %vm5129_vm6, %v1795_v38, -inf  ;;  %vm5130_vm5 = vmmov %vm5124_vm0  ;;  %vm5131_vm0 = vnez %v5067_v37 }
 0x90a   :  { %v1942_v46 = vsel %vm5130_vm5, %v1796_v52, -inf  ;;  %v1799_v49 = vsel %vm5131_vm0, %v4376_v2, -1e+30  ;;  %v1800_v59 = vsel %vm5131_vm0, %v4389_v5, -1e+30  ;;  %vm5132_vm3 = vmmov %vm5126_vm1  ;;  %vm5136_vm5 = vnez %v5071_v43 }
 0x90b   :  { %v1951_v60 = vsel %vm5132_vm3, %v1799_v49, -inf  ;;  %v1954_v55 = vsel %vm5126_vm1, %v1800_v59, -inf  ;;  %v1771_v16 = vsel %vm5133_vm2, %v4376_v2, -1e+30  ;;  %v1772_v3 = vsel %vm5133_vm2, %v4389_v5, -1e+30  ;;  %vm5134_vm8 = vmmov %vm5126_vm1 }
 0x90c   :  { %v1867_v58 = vsel %vm5134_vm8, %v1771_v16, -inf  ;;  %vm5135_vm6 = vmmov %vm5126_vm1  ;;  %v1803_v7 = vsel %vm5136_vm5, %v4376_v2, -1e+30  ;;  %v1804_v0 = vsel %vm5136_vm5, %v4389_v5, -1e+30  ;;  %vm5138_vm8 = vnez %v5073_v47 }
 0x90d   :  { %1916 = vmax.xlane.f32.xlu1 %v1915_v62  ;;  %1919 = vmax.xlane.f32.xlu0 %v1918_v56  ;;  %v1870_v51 = vsel %vm5135_vm6, %v1772_v3, -inf  ;;  %vm5137_vm3 = vmmov %vm5126_vm1  ;;  %v1966_v22 = vsel %vm5126_vm1, %v1804_v0, -inf  ;;  %v1775_v25 = vsel %vm5138_vm8, %v4376_v2, -1e+30  ;;  %v1776_v27 = vsel %vm5138_vm8, %v4389_v5, -1e+30 }
 0x90e   :  { %v1963_v20 = vsel %vm5137_vm3, %v1803_v7, -inf  ;;  %vm5139_vm6 = vmmov %vm5126_vm1  ;;  %v1882_v56 = vsel %vm5140_vm7, %v1776_v27, -inf  ;;  %vm5141_vm3 = vnez %v5075_v50  ;;  %v1760_v0 = vsel %vm4039_vm11, %v4389_v5, -1e+30 }
 0x90f   :  { %v1879_v31 = vsel %vm5139_vm6, %v1775_v25, -inf  ;;  %v1807_v10 = vsel %vm5141_vm3, %v4376_v2, -1e+30  ;;  %v1808_v62 = vsel %vm5141_vm3, %v4389_v5, -1e+30  ;;  %vm5142_vm4 = vmmov %vm5126_vm1  ;;  %vm5143_vm6 = vnez %v5077_v54 }
 0x910   :  { %v1975_v63 = vsel %vm5126_vm1, %v1807_v10, -inf  ;;  %v1780_v18 = vsel %vm5143_vm6, %v4389_v5, -1e+30  ;;  %vm5144_vm7 = vmmov %vm5126_vm1  ;;  %v1768_v25 = vsel %vm4072_vm15, %v4389_v5, -1e+30 }
 0x911   :  { %1928 = vmax.xlane.f32.xlu1 %v1927_v6  ;;  %1931 = vmax.xlane.f32.xlu0 %v1930_v33  ;;  %v1978_v33 = vsel %vm5142_vm4, %v1808_v62, -inf  ;;  %v1779_v6 = vsel %vm5143_vm6, %v4376_v2, -1e+30  ;;  %vm5145_vm8 = vmmov %vm5126_vm1  ;;  %vm5146_vm1 = vnez %v5079_v57 }
 0x912   :  { %v1891_v14 = vsel %vm5144_vm7, %v1779_v6, -inf  ;;  %v1812_v38 = vsel %vm5146_vm1, %v4389_v5, -1e+30  ;;  %vm5147_vm3 = vmmov %vm5142_vm4  ;;  %vm5148_vm7 = vnez %v5081_v61 }
 0x913   :  { %v1784_v49 = vsel %vm5148_vm7, %v4389_v5, -1e+30  ;;  %vm5150_vm6 = vmmov %vm5147_vm3 }
 0x915   :  { %1844 = vmax.xlane.f32.xlu1 %v1843_v29  ;;  %1847 = vmax.xlane.f32.xlu0 %v1846_v32  ;;  %v1894_v29 = vsel %vm5145_vm8, %v1780_v18, -inf  ;;  %v1811_v32 = vsel %vm5146_vm1, %v4376_v2, -1e+30  ;;  %vm5149_vm8 = vmmov %vm5147_vm3 }
 0x916   :  { %v1987_v52 = vsel %vm5142_vm4, %v1811_v32, -inf }
 0x919   :  { %1940 = vmax.xlane.f32.xlu1 %v1939_v17  ;;  %1943 = vmax.xlane.f32.xlu0 %v1942_v46  ;;  %v1990_v17 = vsel %vm5147_vm3, %v1812_v38, -inf  ;;  %v1783_v46 = vsel %vm5148_vm7, %v4376_v2, -1e+30  ;;  %vm5151_vm3 = vnez %v5083_v4 }
 0x91a   :  { %v1903_v59 = vsel %vm5149_vm8, %v1783_v46, -inf  ;;  %v1815_v16 = vsel %vm5151_vm3, %v4376_v2, -1e+30  ;;  %v1816_v3 = vsel %vm5151_vm3, %v4389_v5, -1e+30  ;;  %vm5152_vm8 = vmmov %vm5142_vm4 }
 0x91b   :  { %v2002_v7 = vsel %vm5152_vm8, %v1816_v3, -inf  ;;  %vm5154_vm3 = vmmov %vm5142_vm4 }
 0x91c   :  { %vm5156_vm8 = vmmov %vm5154_vm3 }
 0x91d   :  { %1952 = vmax.xlane.f32.xlu1 %v1951_v60  ;;  %1955 = vmax.xlane.f32.xlu0 %v1954_v55  ;;  %v1906_v60 = vsel %vm5150_vm6, %v1784_v49, -inf  ;;  %v4492_v55 = vpop.trf.xlu0  ;;  %vm5153_vm6 = vmmov %vm5142_vm4  ;;  %v1858_v10 = vsel %vm5156_vm8, %v1768_v25, -inf }
 0x91e   :  { %v1769_v5 = vsel %vm4072_vm15, %v4492_v55, -1e+30  ;;  %v1765_v32 = vsel %vm4031_vm9, %v4492_v55, -1e+30  ;;  %vm5160_vm8 = vmmov %vm5154_vm3  ;;  %v1773_v46 = vsel %vm5133_vm2, %v4492_v55, -1e+30 }
 0x91f   :  { %v1805_v13 = vsel %vm5136_vm5, %v4492_v55, -1e+30  ;;  %v1813_v30 = vsel %vm5146_vm1, %v4492_v55, -1e+30  ;;  %v1785_v34 = vsel %vm5148_vm7, %v4492_v55, -1e+30 }
 0x921   :  { %1868 = vmax.xlane.f32.xlu1 %v1867_v58  ;;  %1871 = vmax.xlane.f32.xlu0 %v1870_v51  ;;  %v1761_v58 = vsel %vm4039_vm11, %v4492_v55, -1e+30  ;;  %v1999_v51 = vsel %vm5142_vm4, %v1815_v16, -inf  ;;  %vm5155_vm4 = vmmov %vm5154_vm3 }
 0x922   :  { %v1837_v2 = vsel %vm5153_vm6, %v1761_v58, -inf  ;;  %vm5157_vm6 = vmmov %vm5154_vm3 }
 0x923   :  { %vm5159_vm11 = vmmov %vm5154_vm3 }
 0x925   :  { %1964 = vmax.xlane.f32.xlu1 %v1963_v20  ;;  %1967 = vmax.xlane.f32.xlu0 %v1966_v22  ;;  %v1793_v20 = vsel %vm4058_vm13, %v4492_v55, -1e+30  ;;  %v1834_v22 = vsel %vm5154_vm3, %v1760_v0, -inf }
 0x926   :  { %v1933_v27 = vsel %vm5155_vm4, %v1793_v20, -inf  ;;  %vm5158_vm4 = vmmov %vm5154_vm3 }
 0x927   :  { %v1861_v6 = vsel %vm5158_vm4, %v1769_v5, -inf  ;;  %vm5164_vm4 = vmmov %vm5154_vm3 }
 0x929   :  { %1880 = vmax.xlane.f32.xlu1 %v1879_v31  ;;  %1883 = vmax.xlane.f32.xlu0 %v1882_v56  ;;  %v1797_v31 = vsel %vm4065_vm14, %v4492_v55, -1e+30  ;;  %v1757_v56 = vsel %vm4035_vm10, %v4492_v55, -1e+30 }
 0x92a   :  { %v1945_v62 = vsel %vm5154_vm3, %v1797_v31, -inf }
 0x92d   :  { %1976 = vmax.xlane.f32.xlu1 %v1975_v63  ;;  %1979 = vmax.xlane.f32.xlu0 %v1978_v33  ;;  %v1825_v63 = vsel %vm5157_vm6, %v1757_v56, -inf  ;;  %v1789_v33 = vsel %vm4051_vm12, %v4492_v55, -1e+30  ;;  %vm5162_vm6 = vmmov %vm5154_vm3 }
 0x92e   :  { %v1921_v18 = vsel %vm5159_vm11, %v1789_v33, -inf  ;;  %vm5161_vm11 = vmmov %vm5154_vm3 }
 0x931   :  { %1892 = vmax.xlane.f32.xlu1 %v1891_v14  ;;  %1895 = vmax.xlane.f32.xlu0 %v1894_v29  ;;  %v4534_v14 = vpop.trf.xlu0  ;;  %v1801_v29 = vsel %vm5131_vm0, %v4492_v55, -1e+30 }
 0x932   :  { %v1758_v38 = vsel %vm4035_vm10, %v4534_v14, -1e+30  ;;  %vm5163_vm10 = vmmov %vm5154_vm3  ;;  %v1770_v25 = vsel %vm4072_vm15, %v4534_v14, -1e+30  ;;  %v1802_v56 = vsel %vm5131_vm0, %v4534_v14, -1e+30  ;;  %vm5176_vm0 = vnez %v5057_v15 }
 0x933   :  { %v1828_v49 = vsel %vm5161_vm11, %v1758_v38, -inf  ;;  %v1969_v16 = vsel %vm5163_vm10, %v1805_v13, -inf  ;;  %vm5166_vm11 = vmmov %vm5154_vm3  ;;  %v1864_v31 = vsel %vm5154_vm3, %v1770_v25, -inf  ;;  %v1762_v37 = vsel %vm5176_vm0, %v4534_v14, -1e+30 }
 0x934   :  { %vm5169_vm10 = vmmov %vm5154_vm3  ;;  %v1790_v40 = vsel %vm4051_vm12, %v4534_v14, -1e+30  ;;  %v2079_v13 = vadd.s32 4294967288, %v4163_v9  ;;  %vm5189_vm0 = vcmask 1042434  }
 0x935   :  { %1988 = vmax.xlane.f32.xlu1 %v1987_v52  ;;  %1991 = vmax.xlane.f32.xlu0 %v1990_v17  ;;  %v1957_v52 = vsel %vm5160_vm8, %v1801_v29, -inf  ;;  %v1849_v17 = vsel %vm5154_vm3, %v1765_v32, -inf  ;;  %vm5165_vm8 = vnez %v5073_v47  ;;  %vm5174_vm15 = vmmov %vm5154_vm3 }
 0x936   :  { %v1777_v58 = vsel %vm5165_vm8, %v4492_v55, -1e+30  ;;  %v1909_v5 = vsel %vm5174_vm15, %v1785_v34, -inf  ;;  %v1778_v32 = vsel %vm5165_vm8, %v4534_v14, -1e+30 }
 0x939   :  { %1904 = vmax.xlane.f32.xlu1 %v1903_v59  ;;  %1907 = vmax.xlane.f32.xlu0 %v1906_v60  ;;  %v1873_v59 = vsel %vm5162_vm6, %v1773_v46, -inf  ;;  %v1794_v60 = vsel %vm4058_vm13, %v4534_v14, -1e+30  ;;  %vm5167_vm13 = vnez %v5075_v50  ;;  %vm5168_vm6 = vmmov %vm5154_vm3  ;;  %v1814_v50 = vsel %vm5146_vm1, %v4534_v14, -1e+30 }
 0x93a   :  { %v1936_v3 = vsel %vm5164_vm4, %v1794_v60, -inf  ;;  %v1809_v26 = vsel %vm5167_vm13, %v4492_v55, -1e+30  ;;  %vm5171_vm4 = vmmov %vm5154_vm3  ;;  %vm2084_vm1 = vcmask 130112  }
 0x93b   :  { %v1981_v20 = vsel %vm5168_vm6, %v1809_v26, -inf  ;;  %vm5175_vm6 = vmmov %vm5154_vm3 }
 0x93d   :  { %2000 = vmax.xlane.f32.xlu1 %v1999_v51  ;;  %2003 = vmax.xlane.f32.xlu0 %v2002_v7  ;;  %v1766_v51 = vsel %vm4031_vm9, %v4534_v14, -1e+30  ;;  %v1885_v7 = vsel %vm5154_vm3, %v1777_v58, -inf  ;;  %vm5170_vm9 = vnez %v5077_v54 }
 0x93e   :  { %v1852_v0 = vsel %vm5166_vm11, %v1766_v51, -inf  ;;  %v1781_v12 = vsel %vm5170_vm9, %v4492_v55, -1e+30  ;;  %vm5173_vm11 = vmmov %vm5154_vm3  ;;  %v1782_v46 = vsel %vm5170_vm9, %v4534_v14, -1e+30  ;;  %vm2098_vm9 = vcmask 261312  }
 0x941   :  { %1835 = vmax.xlane.f32.xlu1 %v1834_v22  ;;  %1838 = vmax.xlane.f32.xlu0 %v1837_v2  ;;  %v1798_v2 = vsel %vm4065_vm14, %v4534_v14, -1e+30  ;;  %vm5172_vm14 = vmmov %vm5154_vm3 }
 0x942   :  { %v1948_v22 = vsel %vm5169_vm10, %v1798_v2, -inf  ;;  %vm5177_vm10 = vmmov %vm5154_vm3 }
 0x945   :  { %1859 = vmax.xlane.f32.xlu1 %v1858_v10  ;;  %1934 = vmax.xlane.f32.xlu0 %v1933_v27  ;;  %v1897_v27 = vsel %vm5171_vm4, %v1781_v12, -inf  ;;  %v1993_v10 = vsel %vm5172_vm14, %v1813_v30, -inf  ;;  %vm5178_vm4 = vmmov %vm5154_vm3 }
 0x949   :  { %1946 = vmax.xlane.f32.xlu0 %v1945_v62  ;;  %1826 = vmax.xlane.f32.xlu1 %v1825_v63  ;;  %v1960_v62 = vsel %vm5173_vm11, %v1802_v56, -inf  ;;  %v1774_v63 = vsel %vm5133_vm2, %v4534_v14, -1e+30  ;;  %vm5179_vm2 = vmmov %vm5154_vm3 }
 0x94a   :  { %v1876_v33 = vsel %vm5175_vm6, %v1774_v63, -inf  ;;  %v1924_v15 = vsel %vm5179_vm2, %v1790_v40, -inf  ;;  %vm5180_vm3 = vmmov %vm5179_vm2  ;;  %vm5188_vm6 = vcmask 1041409  }
 0x94b   :  { %v1888_v38 = vsel %vm5180_vm3, %v1778_v32, -inf  ;;  %vm5182_vm14 = vmmov %vm5179_vm2 }
 0x94c   :  { %vm5183_vm12 = vmmov %vm5179_vm2 }
 0x94d   :  { %1862 = vmax.xlane.f32.xlu0 %v1861_v6  ;;  %1922 = vmax.xlane.f32.xlu1 %v1921_v18  ;;  %v1806_v6 = vsel %vm5136_vm5, %v4534_v14, -1e+30  ;;  %v1840_v18 = vsel %vm5177_vm10, %v1762_v37, -inf  ;;  %vm5181_vm5 = vnez %v5083_v4  ;;  %vm5184_vm8 = vmmov %vm5179_vm2  ;;  %v1786_v4 = vsel %vm5148_vm7, %v4534_v14, -1e+30 }
 0x94e   :  { %v1972_v29 = vsel %vm5178_vm4, %v1806_v6, -inf  ;;  %v1817_v43 = vsel %vm5181_vm5, %v4492_v55, -1e+30  ;;  %v1818_v47 = vsel %vm5181_vm5, %v4534_v14, -1e+30  ;;  %vm5185_vm11 = vmmov %vm5179_vm2  ;;  %vm2091_vm7 = vcmask 195712  }
 0x94f   :  { %v2005_v21 = vsel %vm5182_vm14, %v1817_v43, -inf  ;;  %v2008_v55 = vsel %vm5184_vm8, %v1818_v47, -inf  ;;  %vm5187_vm15 = vmmov %vm5179_vm2  ;;  %vm5190_vm10 = vcmask 1043459   ;;  %vm5191_vm4 = vcmask 1044484  }
 0x950   :  { %v1912_v54 = vsel %vm5187_vm15, %v1786_v4, -inf  ;;  %vm5193_vm3 = vmmov %vm5188_vm6  ;;  %vm5200_vm15 = vcmask 1047559  }
 0x951   :  { %1958 = vmax.xlane.f32.xlu0 %v1957_v52  ;;  %1850 = vmax.xlane.f32.xlu1 %v1849_v17  ;;  %v1810_v52 = vsel %vm5167_vm13, %v4534_v14, -1e+30  ;;  %vm5186_vm13 = vmmov %vm5179_vm2  ;;  %vm5192_vm2 = vcmask 1045509  }
 0x952   :  { %v1984_v17 = vsel %vm5183_vm12, %v1810_v52, -inf  ;;  %vm5194_vm5 = vmmov %vm5189_vm0 }
 0x953   :  { %vm5195_vm14 = vmmov %vm5190_vm10 }
 0x954   :  { %vm5196_vm12 = vmmov %vm5191_vm4 }
 0x955   :  { %1874 = vmax.xlane.f32.xlu0 %v1873_v59  ;;  %1829 = vmax.xlane.f32.xlu1 %v1828_v49  ;;  %v1900_v49 = vsel %vm5185_vm11, %v1782_v46, -inf  ;;  %v1996_v59 = vsel %vm5186_vm13, %v1814_v50, -inf  ;;  %vm5197_vm8 = vmmov %vm5192_vm2  ;;  %vm5198_vm11 = vcmask 1046534  }
 0x956   :  { %vm5199_vm13 = vmmov %vm5198_vm11 }
 0x959   :  { %1970 = vmax.xlane.f32.xlu0 %v1969_v16  ;;  %1937 = vmax.xlane.f32.xlu1 %v1936_v3  ;;  %v4644_v3 = vsub.s32 %v2079_v13, %v3942_v24 }
 0x95d   :  { %1886 = vmax.xlane.f32.xlu0 %v1885_v7  ;;  %1853 = vmax.xlane.f32.xlu1 %v1852_v0 }
 0x961   :  { %1982 = vmax.xlane.f32.xlu0 %v1981_v20  ;;  %1949 = vmax.xlane.f32.xlu1 %v1948_v22 }
 0x965   :  { %1898 = vmax.xlane.f32.xlu0 %v1897_v27  ;;  %1865 = vmax.xlane.f32.xlu1 %v1864_v31 }
 0x969   :  { %1994 = vmax.xlane.f32.xlu0 %v1993_v10  ;;  %1961 = vmax.xlane.f32.xlu1 %v1960_v62 }
 0x96d   :  { %1910 = vmax.xlane.f32.xlu0 %v1909_v5  ;;  %1877 = vmax.xlane.f32.xlu1 %v1876_v33 }
 0x971   :  { %1841 = vmax.xlane.f32.xlu0 %v1840_v18  ;;  %1973 = vmax.xlane.f32.xlu1 %v1972_v29 }
 0x975   :  { %1925 = vmax.xlane.f32.xlu0 %v1924_v15  ;;  %1889 = vmax.xlane.f32.xlu1 %v1888_v38 }
 0x979   :  { %2006 = vmax.xlane.f32.xlu0 %v2005_v21  ;;  %1985 = vmax.xlane.f32.xlu1 %v1984_v17 }
 0x97d   :  { %2009 = vmax.xlane.f32.xlu0 %v2008_v55  ;;  %1901 = vmax.xlane.f32.xlu1 %v1900_v49 }
 0x981   :  { %1997 = vmax.xlane.f32.xlu1 %v1996_v59 }
 0x985   :  { %1913 = vmax.xlane.f32.xlu1 %v1912_v54 }
 0x992   :  { %v1821_v60 = vpop.xlane.xlu1 %1820  ;;  %v4641_v16 = vpop.xlane.xlu0 %1856 }
 0x993   :  { %v2078_v51 = vrot.slane %v1821_v60, %v4167_v35 }
 0x996   :  { %v4646_v57 = vpop.xlane.xlu1 %1832  ;;  %v1824_v58 = vpop.xlane.xlu0 %1823 }
 0x997   :  { %v2083_v61 = vrot.slane %v1824_v58, %v4644_v3 }
 0x999   :  { %v4651_v14 = vsel %vm2084_vm1, %v2083_v61, %v2078_v51 }
 0x99a   :  { %v1917_v7 = vpop.xlane.xlu1 %1916  ;;  %v1920_v0 = vpop.xlane.xlu0 %1919 }
 0x99b   :  { %v2236_v26 = vrot.slane %v1917_v7, %v4167_v35  ;;  %v2240_v2 = vrot.slane %v1920_v0, %v4644_v3 }
 0x99d   :  { %v4656_v20 = vsel %vm2084_vm1, %v2240_v2, %v2236_v26 }
 0x99e   :  { %v1929_v22 = vpop.xlane.xlu1 %1928  ;;  %v1932_v12 = vpop.xlane.xlu0 %1931 }
 0x99f   :  { %v2255_v25 = vrot.slane %v1929_v22, %v4167_v35  ;;  %v2259_v27 = vrot.slane %v1932_v12, %v4644_v3 }
 0x9a1   :  { %v4661_v31 = vsel %vm2084_vm1, %v2259_v27, %v2255_v25 }
 0x9a2   :  { %v1845_v30 = vpop.xlane.xlu1 %1844  ;;  %v1848_v56 = vpop.xlane.xlu0 %1847 }
 0x9a3   :  { %v2122_v10 = vrot.slane %v1845_v30, %v4167_v35  ;;  %v2126_v62 = vrot.slane %v1848_v56, %v4644_v3 }
 0x9a5   :  { %v4666_v34 = vsel %vm2084_vm1, %v2126_v62, %v2122_v10 }
 0x9a6   :  { %v1941_v63 = vpop.xlane.xlu1 %1940  ;;  %v1944_v5 = vpop.xlane.xlu0 %1943 }
 0x9a7   :  { %v2274_v33 = vrot.slane %v1941_v63, %v4167_v35  ;;  %v2278_v37 = vrot.slane %v1944_v5, %v4644_v3 }
 0x9a9   :  { %v4671_v6 = vsel %vm2084_vm1, %v2278_v37, %v2274_v33 }
 0x9aa   :  { %v1953_v18 = vpop.xlane.xlu1 %1952  ;;  %v1956_v29 = vpop.xlane.xlu0 %1955 }
 0x9ab   :  { %v2293_v40 = vrot.slane %v1953_v18, %v4167_v35  ;;  %v2297_v32 = vrot.slane %v1956_v29, %v4644_v3 }
 0x9ad   :  { %v4676_v15 = vsel %vm2084_vm1, %v2297_v32, %v2293_v40 }
 0x9ae   :  { %v1869_v38 = vpop.xlane.xlu1 %1868  ;;  %v1872_v43 = vpop.xlane.xlu0 %1871 }
 0x9af   :  { %v2160_v52 = vrot.slane %v1869_v38, %v4167_v35  ;;  %v2164_v21 = vrot.slane %v1872_v43, %v4644_v3 }
 0x9b1   :  { %v4681_v17 = vsel %vm2084_vm1, %v2164_v21, %v2160_v52 }
 0x9b2   :  { %v1965_v47 = vpop.xlane.xlu1 %1964  ;;  %v1968_v46 = vpop.xlane.xlu0 %1967 }
 0x9b3   :  { %v2312_v55 = vrot.slane %v1965_v47, %v4167_v35  ;;  %v2316_v49 = vrot.slane %v1968_v46, %v4644_v3 }
 0x9b5   :  { %v4686_v50 = vsel %vm2084_vm1, %v2316_v49, %v2312_v55 }
 0x9b6   :  { %v1881_v59 = vpop.xlane.xlu1 %1880  ;;  %v1884_v4 = vpop.xlane.xlu0 %1883 }
 0x9b7   :  { %v2179_v54 = vrot.slane %v1881_v59, %v4167_v35  ;;  %v2183_v13 = vrot.slane %v1884_v4, %v4644_v3 }
 0x9b9   :  { %v4691_v60 = vsel %vm2084_vm1, %v2183_v13, %v2179_v54 }
 0x9ba   :  { %v1977_v58 = vpop.xlane.xlu1 %1976  ;;  %v1980_v51 = vpop.xlane.xlu0 %1979 }
 0x9bb   :  { %v2331_v61 = vrot.slane %v1977_v58, %v4167_v35  ;;  %v2335_v7 = vrot.slane %v1980_v51, %v4644_v3 }
 0x9bd   :  { %v4696_v0 = vsel %vm2084_vm1, %v2335_v7, %v2331_v61 }
 0x9be   :  { %v1893_v26 = vpop.xlane.xlu1 %1892  ;;  %v1896_v2 = vpop.xlane.xlu0 %1895 }
 0x9bf   :  { %v2198_v22 = vrot.slane %v1893_v26, %v4167_v35  ;;  %v2202_v12 = vrot.slane %v1896_v2, %v4644_v3  ;;  %v2086_v2 = vadd.s32 4294967280, %v4163_v9 }
 0x9c1   :  { %v4701_v25 = vsel %vm2084_vm1, %v2202_v12, %v2198_v22 }
 0x9c2   :  { %v1989_v27 = vpop.xlane.xlu1 %1988  ;;  %v1992_v30 = vpop.xlane.xlu0 %1991 }
 0x9c3   :  { %v2350_v56 = vrot.slane %v1989_v27, %v4167_v35  ;;  %v2354_v10 = vrot.slane %v1992_v30, %v4644_v3  ;;  %v2093_v27 = vadd.s32 4294967272, %v4163_v9  ;;  %v4732_v30 = vsub.s32 %v2086_v2, %v3942_v24 }
 0x9c5   :  { %v4706_v62 = vsel %vm2084_vm1, %v2354_v10, %v2350_v56 }
 0x9c6   :  { %v1905_v63 = vpop.xlane.xlu1 %1904  ;;  %v1908_v5 = vpop.xlane.xlu0 %1907 }
 0x9c7   :  { %v2217_v33 = vrot.slane %v1905_v63, %v4167_v35  ;;  %v2221_v37 = vrot.slane %v1908_v5, %v4644_v3  ;;  %v2103_v5 = vrot.slane %v4646_v57, %v4167_v35 }
 0x9c9   :  { %v4711_v18 = vsel %vm2084_vm1, %v2221_v37, %v2217_v33  ;;  %v4742_v33 = vsub.s32 %v2093_v27, %v3942_v24  ;;  %v2141_v24 = vrot.slane %v4641_v16, %v4167_v35 }
 0x9ca   :  { %v4713_v29 = vpop.xlane.xlu1 %2000  ;;  %v4715_v40 = vpop.xlane.xlu0 %2003 }
 0x9ce   :  { %v1836_v32 = vpop.xlane.xlu1 %1835  ;;  %v1839_v38 = vpop.xlane.xlu0 %1838 }
 0x9cf   :  { %v2107_v56 = vrot.slane %v1836_v32, %v4644_v3  ;;  %v2112_v37 = vrot.slane %v1839_v38, %v4732_v30 }
 0x9d1   :  { %v2108_v2 = vsel %vm2084_vm1, %v2107_v56, %v2103_v5 }
 0x9d2   :  { %v1860_v43 = vpop.xlane.xlu1 %1859  ;;  %v1935_v52 = vpop.xlane.xlu0 %1934 }
 0x9d3   :  { %v2145_v48 = vrot.slane %v1860_v43, %v4644_v3  ;;  %v2264_v9 = vrot.slane %v1935_v52, %v4732_v30 }
 0x9d5   :  { %v2265_v56 = vsel %vm2091_vm7, %v2264_v9, %v4661_v31 }
 0x9d6   :  { %v1827_v21 = vpop.xlane.xlu1 %1826  ;;  %v1947_v47 = vpop.xlane.xlu0 %1946 }
 0x9d7   :  { %v2090_v32 = vrot.slane %v1827_v21, %v4732_v30  ;;  %v2283_v23 = vrot.slane %v1947_v47, %v4732_v30  ;;  %v2113_v21 = vsel %vm2091_vm7, %v2112_v37, %v2108_v2  ;;  %v2146_v47 = vsel %vm2084_vm1, %v2145_v48, %v2141_v24 }
 0x9da   :  { %v1923_v46 = vpop.xlane.xlu1 %1922  ;;  %v1863_v55 = vpop.xlane.xlu0 %1862 }
 0x9db   :  { %v2245_v57 = vrot.slane %v1923_v46, %v4732_v30  ;;  %v2150_v38 = vrot.slane %v1863_v55, %v4732_v30  ;;  %v2092_v46 = vsel %vm2091_vm7, %v2090_v32, %v4651_v14  ;;  %v2284_v55 = vsel %vm2091_vm7, %v2283_v23, %v4671_v6 }
 0x9dd   :  { %v2246_v48 = vsel %vm2091_vm7, %v2245_v57, %v4656_v20  ;;  %v2151_v37 = vsel %vm2091_vm7, %v2150_v38, %v2146_v47 }
 0x9de   :  { %v1851_v49 = vpop.xlane.xlu1 %1850  ;;  %v4717_v59 = vpop.xlane.xlu0 %1958 }
 0x9df   :  { %v2131_v43 = vrot.slane %v1851_v49, %v4732_v30  ;;  %v2302_v31 = vrot.slane %v4717_v59, %v4732_v30 }
 0x9e1   :  { %v2132_v14 = vsel %vm2091_vm7, %v2131_v43, %v4666_v34 }
 0x9e2   :  { %v1830_v4 = vpop.xlane.xlu1 %1829  ;;  %v1875_v54 = vpop.xlane.xlu0 %1874 }
 0x9e3   :  { %v2097_v52 = vrot.slane %v1830_v4, %v4742_v33  ;;  %v2169_v27 = vrot.slane %v1875_v54, %v4732_v30 }
 0x9e5   :  { %v2099_v23 = vsel %vm2098_vm9, %v2097_v52, %v2092_v46  ;;  %v2170_v6 = vsel %vm2091_vm7, %v2169_v27, %v4681_v17 }
 0x9e6   :  { %v4719_v13 = vpop.xlane.xlu1 %1937  ;;  %v4721_v58 = vpop.xlane.xlu0 %1970 }
 0x9e7   :  { %v2269_v20 = vrot.slane %v4719_v13, %v4742_v33 }
 0x9e9   :  { %v2270_v27 = vsel %vm2098_vm9, %v2269_v20, %v2265_v56 }
 0x9ea   :  { %v1854_v51 = vpop.xlane.xlu1 %1853  ;;  %v1887_v61 = vpop.xlane.xlu0 %1886 }
 0x9eb   :  { %v2136_v16 = vrot.slane %v1854_v51, %v4742_v33  ;;  %v2188_v49 = vrot.slane %v1887_v61, %v4732_v30 }
 0x9ed   :  { %v2137_v59 = vsel %vm2098_vm9, %v2136_v16, %v2132_v14  ;;  %v2189_v34 = vsel %vm2091_vm7, %v2188_v49, %v4691_v60  ;;  %v2303_v16 = vsel %vm2091_vm7, %v2302_v31, %v4676_v15 }
 0x9ee   :  { %v4723_v7 = vpop.xlane.xlu1 %1949  ;;  %v4725_v26 = vpop.xlane.xlu0 %1982 }
 0x9ef   :  { %v2288_v2 = vrot.slane %v4723_v7, %v4742_v33  ;;  %v2340_v60 = vrot.slane %v4725_v26, %v4732_v30 }
 0x9f1   :  { %v2289_v46 = vsel %vm2098_vm9, %v2288_v2, %v2284_v55  ;;  %v2341_v15 = vsel %vm2091_vm7, %v2340_v60, %v4696_v0  ;;  %v2369_v0 = vrot.slane %v4713_v29, %v4167_v35 }
 0x9f2   :  { %v1866_v22 = vpop.xlane.xlu1 %1865  ;;  %v4728_v12 = vpop.xlane.xlu0 %1898 }
 0x9f3   :  { %v2155_v4 = vrot.slane %v1866_v22, %v4742_v33  ;;  %v2321_v22 = vrot.slane %v4721_v58, %v4732_v30  ;;  %v2207_v55 = vrot.slane %v4728_v12, %v4732_v30  ;;  %v2373_v12 = vrot.slane %v4715_v40, %v4644_v3 }
 0x9f5   :  { %v2156_v17 = vsel %vm2098_vm9, %v2155_v4, %v2151_v37  ;;  %v2322_v56 = vsel %vm2091_vm7, %v2321_v22, %v4686_v50  ;;  %v2208_v22 = vsel %vm2091_vm7, %v2207_v55, %v4701_v25  ;;  %v2374_v29 = vsel %vm2084_vm1, %v2373_v12, %v2369_v0  ;;  %vm5201_vm1 = vmmov %vm5200_vm15 }
 0x9f6   :  { %v4735_v10 = vpop.xlane.xlu1 %1961  ;;  %v4737_v63 = vpop.xlane.xlu0 %1994 }
 0x9f7   :  { %v2307_v13 = vrot.slane %v4735_v10, %v4742_v33 }
 0x9fa   :  { %v1878_v36 = vpop.xlane.xlu1 %1877  ;;  %v4750_v28 = vpop.xlane.xlu0 %1910 }
 0x9fb   :  { %v2174_v61 = vrot.slane %v1878_v36, %v4742_v33  ;;  %v2226_v25 = vrot.slane %v4750_v28, %v4732_v30  ;;  %v1513_v28 = vmax.f32 %v4353_v19, 0.0  ;;  %v3303_v19 = vld [vmem:[%s4998_s21] ss:$0 sm:$0xff] }
 0x9fd   :  { %v2175_v7 = vsel %vm2098_vm9, %v2174_v61, %v2170_v6 }
 0x9fe   :  { %v1974_v54 = vpop.xlane.xlu1 %1973  ;;  %v1842_v5 = vpop.xlane.xlu0 %1841 }
 0x9ff   :  { %v2117_v51 = vrot.slane %v1842_v5, %v4742_v33  ;;  %v2326_v43 = vrot.slane %v1974_v54, %v4742_v33  ;;  %v2308_v5 = vsel %vm2098_vm9, %v2307_v13, %v2303_v16 }
 0xa01   :  { %v2118_v9 = vsel %vm2098_vm9, %v2117_v51, %v2113_v21  ;;  %v2327_v31 = vsel %vm2098_vm9, %v2326_v43, %v2322_v56 }
 0xa02   :  { %v2385_v36 = vsel %vm5188_vm6, %v2118_v9, %v2099_v23  ;;  %v1890_v32 = vpop.xlane.xlu1 %1889  ;;  %v1926_v24 = vpop.xlane.xlu0 %1925  ;;  %vm5202_vm6 = vcmask 130048  }
 0xa03   :  { %v2386_v58 = vsel %vm5189_vm0, %v2137_v59, %v2385_v36  ;;  %v2193_v57 = vrot.slane %v1890_v32, %v4742_v33  ;;  %v2250_v38 = vrot.slane %v1926_v24, %v4742_v33  ;;  %v2359_v59 = vrot.slane %v4737_v63, %v4732_v30  ;;  %vm5205_vm0 = vmmov %vm5202_vm6 }
 0xa04   :  { %v2387_v52 = vsel %vm5190_vm10, %v2156_v17, %v2386_v58  ;;  %vm5206_vm10 = vmmov %vm5205_vm0 }
 0xa05   :  { %v2194_v21 = vsel %vm2098_vm9, %v2193_v57, %v2189_v34  ;;  %v2388_v10 = vsel %vm5191_vm4, %v2175_v7, %v2387_v52  ;;  %v2251_v47 = vsel %vm2098_vm9, %v2250_v38, %v2246_v48  ;;  %v2360_v3 = vsel %vm2091_vm7, %v2359_v59, %v4706_v62  ;;  %vm5207_vm4 = vmmov %vm5205_vm0 }
 0xa06   :  { %v2389_v26 = vsel %vm5192_vm2, %v2194_v21, %v2388_v10  ;;  %v2392_v49 = vsel %vm5193_vm3, %v2270_v27, %v2251_v47  ;;  %v1986_v4 = vpop.xlane.xlu1 %1985  ;;  %v2007_v54 = vpop.xlane.xlu0 %2006  ;;  %v2227_v38 = vsel %vm2091_vm7, %v2226_v25, %v4711_v18  ;;  %v1514_v62 = vmax.f32 %v4351_v8, 0.0  ;;  %vm5208_vm2 = vmmov %vm5205_vm0  ;;  %v3770_v18 = vld [vmem:[%s4984_s2] sm:$0xff] }
 0xa07   :  { %v2393_v37 = vsel %vm5194_vm5, %v2289_v46, %v2392_v49  ;;  %v2345_v48 = vrot.slane %v1986_v4, %v4742_v33  ;;  %v2378_v9 = vrot.slane %v2007_v54, %v4732_v30  ;;  %vm5209_vm3 = vcmask 64512  }
 0xa08   :  { %v2394_v51 = vsel %vm5195_vm14, %v2308_v5, %v2393_v37  ;;  %v3684_v43 = vpack.c.bf16 %v1514_v62, %v1513_v28  ;;  %vm5211_vm5 = vcmask 261120   ;;  %vm5212_vm14 = vmmov %vm5205_vm0 }
 0xa09   :  { %v2346_v14 = vsel %vm2098_vm9, %v2345_v48, %v2341_v15  ;;  %v2395_v50 = vsel %vm5196_vm12, %v2327_v31, %v2394_v51  ;;  %v2379_v40 = vsel %vm2091_vm7, %v2378_v9, %v2374_v29  ;;  %vm5203_vm7 = vmmov %vm5202_vm6  ;;  %v5210_v31 = vld [vmem:[#allocation2_spill] sm:$0xff] }
 0xa0a   :  { %v2396_v23 = vsel %vm5197_vm8, %v2346_v14, %v2395_v50  ;;  %v1902_v6 = vpop.xlane.xlu1 %1901  ;;  %v2010_v20 = vpop.xlane.xlu0 %2009  ;;  %vm5213_vm12 = vmmov %vm5205_vm0 }
 0xa0b   :  { %v2212_v61 = vrot.slane %v1902_v6, %v4742_v33  ;;  %v2383_v2 = vrot.slane %v2010_v20, %v4742_v33  ;;  %vm5214_vm8 = vmmov %vm5205_vm0  ;;  %v3771_v6 = vld [vmem:[%s4984_s2 + $0x8] sm:$0xff] }
 0xa0d   :  { %v2213_v34 = vsel %vm2098_vm9, %v2212_v61, %v2208_v22  ;;  %v2384_v32 = vsel %vm2098_vm9, %v2383_v2, %v2379_v40 }
 0xa0e   :  { %v1998_v17 = vpop.xlane.xlu1 %1997  ;;  %v2390_v36 = vsel %vm5198_vm11, %v2213_v34, %v2389_v26  ;;  %vm5215_vm11 = vmmov %vm5205_vm0 }
 0xa0f   :  { %v2364_v35 = vrot.slane %v1998_v17, %v4742_v33 }
 0xa11   :  { %v2365_v63 = vsel %vm2098_vm9, %v2364_v35, %v2360_v3 }
 0xa12   :  { %v1914_v24 = vpop.xlane.xlu1 %1913  ;;  %v2397_v13 = vsel %vm5199_vm13, %v2365_v63, %v2396_v23  ;;  %v5216_v23 = vld [vmem:[#allocation3_spill] sm:$0xff]  ;;  %vm5217_vm13 = vmmov %vm5211_vm5 }
 0xa13   :  { %v2231_v58 = vrot.slane %v1914_v24, %v4742_v33  ;;  %v2398_v57 = vsel %vm5200_vm15, %v2384_v32, %v2397_v13  ;;  %vm5218_vm15 = vmmov %vm5209_vm3 }
 0xa15   :  { %v2232_v30 = vsel %vm2098_vm9, %v2231_v58, %v2227_v38  ;;  %vm5204_vm9 = vmmov %vm5202_vm6 }
 0xa16   :  { %v2391_v60 = vsel %vm5201_vm1, %v2232_v30, %v2390_v36  ;;  %vm5220_vm1 = vmmov %vm5211_vm5 }
 0xa17   :  { %v3668_v7 = vpack.c.bf16 %v2398_v57, %v2391_v60 }
 0xa19   :  { %3669 = vmatprep.subr.bf16.mxu0 %v3668_v7 }
 0xa1a   :  { %3671 = vmatpush3.bf16.msra.mxu0 %v3668_v7 }
 0xa1b   :  { %3685 = vmatprep.subr.bf16.mxu0 %v3684_v43 }
 0xa1d   :  { %3545 = vmatmul.mubr.msk.f32.vlgmr.msra.gmra.mrb[18].mxu0 %vm5202_vm6, %v4203_v41 }
 0xa1e   :  { %3547 = vmatprep.mubr.msk.f32.mxu0 %vm5203_vm7, %v4207_v42  ;;  %3687 = vmatpush3.bf16.msra.mxu0 %v3684_v43 }
 0xa21   :  { %3548 = vmatmul.mubr.msk.f32.gmra.mrb[20].mxu0 %vm5204_vm9, %v4211_v45  ;;  %vm5221_vm9 = vcmask 1043456  }
 0xa22   :  { %3575 = vmatprep.mubr.msk.f32.mxu0 %vm5205_vm0, %v4199_v39  ;;  %vm5222_vm0 = vmmov %vm5221_vm9 }
 0xa25   :  { %3576 = vmatmul.mubr.msk.f32.vlgmr.msra.gmra.mrb[22].mxu0 %vm5206_vm10, %v4203_v41  ;;  %vm5223_vm10 = vcmask 31744  }
 0xa26   :  { %3578 = vmatprep.mubr.msk.f32.mxu0 %vm5207_vm4, %v4207_v42  ;;  %vm5224_vm4 = vmmov %vm5223_vm10 }
 0xa29   :  { %3579 = vmatmul.mubr.msk.f32.gmra.mrb[24].mxu0 %vm5208_vm2, %v4211_v45  ;;  %vm5227_vm2 = vmmov %vm5220_vm1 }
 0xa2a   :  { %3594 = vmatprep.mubr.msk.f32.mxu0 %vm5209_vm3, %v3770_v18  ;;  %vm5228_vm3 = vmmov %vm5220_vm1 }
 0xaf0   :  { %v3546_v33 = vpop.f32.mrb[18].mxu0 }
 0xaf1   :  { %v2487_v52 = vsub.f32 %v4367_v44, %v3546_v33  ;;  %v2467_v27 = vpop.f32.mrb[19].mxu0 }
 0xaf2   :  { %v2486_v21 = vsub.f32 %v4364_v53, %v2467_v27 }
 0xaf3   :  { %v2492_v10 = vmul.f32 1.442695, %v2487_v52 }
 0xaf4   :  { %v2490_v47 = vmul.f32 1.442695, %v2486_v21  ;;  %v3549_v16 = vpop.f32.mrb[20].mxu0 }
 0xaf5   :  { %3746 = vpow2.f32 %v2492_v10  ;;  %v2489_v46 = vsub.f32 %v4373_v11, %v3549_v16  ;;  %v2477_v26 = vpop.f32.mrb[21].mxu0  ;;  %v5219_v16 = vld [vmem:[#allocation4_spill] sm:$0xff] }
 0xaf6   :  { %3748 = vpow2.f32 %v2490_v47  ;;  %v2488_v49 = vsub.f32 %v4370_v1, %v2477_v26 }
 0xaf7   :  { %v2496_v4 = vmul.f32 1.442695, %v2489_v46 }
 0xaf8   :  { %v2494_v54 = vmul.f32 1.442695, %v2488_v49  ;;  %v4884_v56 = vpop.f32.mrb[22].mxu0 }
 0xaf9   :  { %3750 = vpow2.f32 %v2496_v4  ;;  %v4886_v5 = vpop.f32.mrb[23].mxu0 }
 0xafa   :  { %3752 = vpow2.f32 %v2494_v54  ;;  %v3020_v54 = vld [vmem:[%s4994_s20 + $0x10] sm:$0xff] }
 0xafc   :  { %v4888_v44 = vpop.f32.mrb[24].mxu0 }
 0xafd   :  { %v4890_v53 = vpop.f32.mrb[25].mxu0 }
 0xaff   :  { %v3747_v37 = vpop.eup %3746 }
 0xb00   :  { %v3749_v48 = vpop.eup %3748 }
 0xb01   :  { %v3672_v15 = vpack.c.bf16 %v3747_v37, %v3749_v48 }
 0xb03   :  { %v3751_v11 = vpop.eup %3750  ;;  %3673 = vmatprep.subr.bf16.mxu1 %v3672_v15 }
 0xb04   :  { %v3753_v55 = vpop.eup %3752  ;;  %3675 = vmatpush3.bf16.msra.mxu1 %v3672_v15  ;;  %v3119_v15 = vld [vmem:[%s4996_s22 + $0x8] sm:$0xff] }
 0xb05   :  { %v3676_v1 = vpack.c.bf16 %v3751_v11, %v3753_v55 }
 0xb07   :  { %3677 = vmatprep.subr.bf16.mxu1 %v3676_v1 }
 0xb08   :  { %3679 = vmatpush3.bf16.msra.mxu1 %v3676_v1  ;;  %v3120_v1 = vld [vmem:[%s4996_s22 + $0x10] sm:$0xff] }
 0xb0b   :  { %3559 = vmatmul.mubr.msk.f32.vlgmr.msra.gmra.mrb[20].mxu1 %vm5211_vm5, %v5210_v31  ;;  %v3121_v31 = vld [vmem:[%s4996_s22 + $0x18] sm:$0xff]  ;;  %vm5229_vm5 = vmmov %vm5220_vm1 }
 0xb0c   :  { %3565 = vmatprep.mubr.msk.f32.mxu1 %vm5212_vm14, %v4199_v39  ;;  %v2844_v39 = vld [vmem:[%s4993_s17] sm:$0xff]  ;;  %vm5230_vm14 = vmmov %vm5220_vm1 }
 0xb0d   :  { %3592 = vmatprep.subr.mxu0 %v2844_v39 }
 0xb0e   :  { %3593 = vmatpush3.msra.mxu0 %v2844_v39 }
 0xb0f   :  { %3595 = vmatmul.mubr.msk.f32.vlgmr.msra.gmra.mrb[26].mxu0 %vm5218_vm15, %v3771_v6  ;;  %v3708_v6 = vpack.c.bf16 %v3121_v31, %v3120_v1  ;;  %vm5233_vm15 = vmmov %vm5224_vm4 }
 0xbde   :  { %v3560_v51 = vpop.f32.mrb[20].mxu1 }
 0xbdf   :  { %v2564_v14 = vpop.f32.mrb[21].mxu1 }
 0xbe0   :  { %v3680_v50 = vpack.c.bf16 %v3560_v51, %v2564_v14  ;;  %v5225_v14 = vld [vmem:[#allocation5_spill] sm:$0xff] }
 0xbe2   :  { %3681 = vmatprep.subr.bf16.mxu1 %v3680_v50  ;;  %v3596_v46 = vpop.f32.mrb[26].mxu0 }
 0xbe3   :  { %3683 = vmatpush3.bf16.msra.mxu1 %v3680_v50  ;;  %vm2921_vm6 = vcmp.gt.f32.partialorder %v3596_v46, 0.0  ;;  %v2923_v26 = vmul.f32 0.2, %v3596_v46  ;;  %v2911_v49 = vpop.f32.mrb[27].mxu0 }
 0xbe4   :  { %vm2920_vm7 = vcmp.gt.f32.partialorder %v2911_v49, 0.0  ;;  %v2922_v4 = vmul.f32 0.2, %v2911_v49 }
 0xbe6   :  { %3566 = vmatmul.mubr.msk.f32.vlgmr.msra.gmra.mrb[22].mxu1 %vm5213_vm12, %v4203_v41  ;;  %v3018_v41 = vld [vmem:[%s4994_s20] sm:$0xff] }
 0xbe7   :  { %3568 = vmatprep.mubr.msk.f32.mxu1 %vm5214_vm8, %v4207_v42  ;;  %v3019_v42 = vld [vmem:[%s4994_s20 + $0x8] sm:$0xff] }
 0xbea   :  { %3569 = vmatmul.mubr.msk.f32.gmra.mrb[24].mxu1 %vm5215_vm11, %v4211_v45  ;;  %v3696_v45 = vpack.c.bf16 %v3019_v42, %v3018_v41  ;;  %vm5231_vm11 = vmmov %vm5224_vm4 }
 0xbeb   :  { %3589 = vmatprep.mubr.msk.f32.mxu1 %vm5217_vm13, %v5216_v23  ;;  %v5226_v23 = vld [vmem:[#allocation6_spill] sm:$0xff]  ;;  %vm5232_vm13 = vmmov %vm5224_vm4 }
 0xbec   :  { %3697 = vmatprep.subr.bf16.mxu0 %v3696_v45 }
 0xbed   :  { %3699 = vmatpush3.bf16.msra.mxu0 %v3696_v45  ;;  %v3299_v45 = vld [vmem:[%s4997_s19] ss:$0 sm:$0xff] }
 0xcb9   :  { %v3567_v61 = vpop.f32.mrb[22].mxu1 }
 0xcba   :  { %v2645_v20 = vadd.f32 1e-16, %v3567_v61  ;;  %v2639_v0 = vpop.f32.mrb[23].mxu1 }
 0xcbb   :  { %v2640_v12 = vadd.f32 1e-16, %v2639_v0 }
 0xcbc   :  { %3754 = vrcp.f32 %v2645_v20 }
 0xcbd   :  { %3756 = vrcp.f32 %v2640_v12  ;;  %v3570_v22 = vpop.f32.mrb[24].mxu1 }
 0xcbe   :  { %v2655_v59 = vadd.f32 1e-16, %v3570_v22  ;;  %v2649_v9 = vpop.f32.mrb[25].mxu1 }
 0xcbf   :  { %v2650_v34 = vadd.f32 1e-16, %v2649_v9 }
 0xcc0   :  { %3758 = vrcp.f32 %v2655_v59 }
 0xcc1   :  { %3760 = vrcp.f32 %v2650_v34 }
 0xcc6   :  { %v3755_v2 = vpop.eup %3754 }
 0xcc7   :  { %v3757_v17 = vpop.eup %3756  ;;  %v2663_v36 = vmul.f32 %v3755_v2, %v2645_v20 }
 0xcc8   :  { %v2662_v35 = vmul.f32 %v3757_v17, %v2640_v12 }
 0xcc9   :  { %v2667_v29 = vsub.f32 2.0, %v2663_v36 }
 0xcca   :  { %v3759_v3 = vpop.eup %3758  ;;  %v2666_v25 = vsub.f32 2.0, %v2662_v35 }
 0xccb   :  { %v3761_v40 = vpop.eup %3760  ;;  %v2671_v63 = vmul.f32 %v3755_v2, %v2667_v29  ;;  %v2665_v32 = vmul.f32 %v3759_v3, %v2655_v59 }
 0xccc   :  { %v2670_v24 = vmul.f32 %v3757_v17, %v2666_v25  ;;  %v2664_v13 = vmul.f32 %v3761_v40, %v2650_v34 }
 0xccd   :  { %v2675_v58 = vmul.f32 %v3747_v37, %v2671_v63  ;;  %v2669_v57 = vsub.f32 2.0, %v2665_v32  ;;  %v2924_v37 = vsel %vm2920_vm7, %v2911_v49, %v2922_v4 }
 0xcce   :  { %v2674_v38 = vmul.f32 %v3749_v48, %v2670_v24  ;;  %v2668_v30 = vsub.f32 2.0, %v2664_v13  ;;  %v3118_v48 = vld [vmem:[%s4996_s22] sm:$0xff] }
 0xccf   :  { %v2673_v60 = vmul.f32 %v3759_v3, %v2669_v57  ;;  %v2764_v7 = vmul.f32 %v4884_v56, %v2675_v58  ;;  %v3021_v56 = vld [vmem:[%s4994_s20 + $0x18] sm:$0xff] }
 0xcd0   :  { %v2672_v43 = vmul.f32 %v3761_v40, %v2668_v30  ;;  %v2763_v18 = vmul.f32 %v4886_v5, %v2674_v38  ;;  %v3700_v5 = vpack.c.bf16 %v3021_v56, %v3020_v54 }
 0xcd1   :  { %v2677_v33 = vmul.f32 %v3751_v11, %v2673_v60  ;;  %v3704_v11 = vpack.c.bf16 %v3119_v15, %v3118_v48 }
 0xcd2   :  { %v2676_v52 = vmul.f32 %v3753_v55, %v2672_v43  ;;  %v3688_v27 = vpack.c.bf16 %v2764_v7, %v2763_v18  ;;  %3701 = vmatprep.subr.bf16.mxu0 %v3700_v5 }
 0xcd3   :  { %v2766_v21 = vmul.f32 %v4888_v44, %v2677_v33  ;;  %v2926_v44 = vld [vmem:[%s4995_s18] sm:$0xf]  ;;  %3703 = vmatpush3.bf16.msra.mxu0 %v3700_v5 }
 0xcd4   :  { %3689 = vmatprep.subr.bf16.mxu1 %v3688_v27  ;;  %v2765_v10 = vmul.f32 %v4890_v53, %v2676_v52  ;;  %v2925_v53 = vsel %vm2921_vm6, %v3596_v46, %v2923_v26  ;;  %3705 = vmatprep.subr.bf16.mxu0 %v3704_v11 }
 0xcd5   :  { %3691 = vmatpush3.bf16.msra.mxu1 %v3688_v27 }
 0xcd6   :  { %v3692_v47 = vpack.c.bf16 %v2766_v21, %v2765_v10 }
 0xcd8   :  { %3693 = vmatprep.subr.bf16.mxu1 %v3692_v47 }
 0xcd9   :  { %3695 = vmatpush3.bf16.msra.mxu1 %v3692_v47 }
 0xcda   :  { %3597 = vmatprep.subr.msk.mxu1 %vm5221_vm9, %v2926_v44 }
 0xcdc   :  { %3590 = vmatmul.mubr.msk.f32.vlgmr.msra.gmra.mrb[26].mxu1 %vm5220_vm1, %v5219_v16  ;;  %vm5234_vm1 = vmmov %vm5224_vm4 }
 0xcdd   :  { %3598 = vmatpush3.msk.msra.mxu1 %vm5222_vm0, %v2926_v44  ;;  %3599 = vmatprep.mubr.msk.f32.mxu1 %vm5223_vm10, %v2924_v37  ;;  %vm5235_vm6 = vmmov %vm5234_vm1 }
 0xcde   :  { %vm5236_vm7 = vmmov %vm5234_vm1 }
 0xce0   :  { %3600 = vmatmul.mubr.msk.f32.vlgmr.msra.gmra.mrb[28].mxu1 %vm5224_vm4, %v2925_v53 }
 0xdaf   :  { %v3591_v55 = vpop.f32.mrb[26].mxu1 }
 0xdb0   :  { %v2833_v51 = vpop.f32.mrb[27].mxu1  ;;  %v2843_v39 = vmul.f32 %v3591_v55, %v5226_v23 }
 0xdb1   :  { %v2842_v50 = vmul.f32 %v2833_v51, %v5225_v14 }
 0xdb3   :  { %3610 = vmatprep.mubr.msk.f32.mxu0 %vm5227_vm2, %v2842_v50  ;;  %v3601_v41 = vpop.f32.mrb[28].mxu1 }
 0xdb4   :  { %3611 = vmatmul.mubr.msk.f32.vlgmr.msra.gmra.mrb[28].mxu0 %vm5228_vm3, %v2843_v39  ;;  %v3009_v42 = vpop.f32.mrb[29].mxu1  ;;  %v3015_v61 = vadd.f32 %v3601_v41, %v3299_v45 }
 0xdb5   :  { %3707 = vmatpush3.bf16.msra.mxu0 %v3704_v11  ;;  %3621 = vmatprep.mubr.msk.f32.mxu0 %vm5229_vm5, %v1513_v28  ;;  %v3010_v20 = vadd.f32 %v3299_v45, %v3009_v42 }
 0xdb6   :  { %3709 = vmatprep.subr.bf16.mxu0 %v3708_v6  ;;  %v3113_v0 = vmul.f32 0.01, %v3015_v61  ;;  %vm3111_vm12 = vcmp.gt.f32.partialorder %v3015_v61, 0.0 }
 0xdb7   :  { %v3112_v12 = vmul.f32 0.01, %v3010_v20  ;;  %vm3110_vm8 = vcmp.gt.f32.partialorder %v3010_v20, 0.0 }
 0xdb8   :  { %v3115_v28 = vsel %vm3111_vm12, %v3015_v61, %v3113_v0 }
 0xdb9   :  { %3711 = vmatpush3.bf16.msra.mxu0 %v3708_v6  ;;  %v3114_v8 = vsel %vm3110_vm8, %v3010_v20, %v3112_v12  ;;  %v3716_v22 = vadd.f32 %v3303_v19, %v3115_v28 }
 0xdba   :  { %v3718_v59 = vadd.f32 %v3303_v19, %v3114_v8 }
 0xdbc   :  { %3622 = vmatmul.mubr.msk.f32.vlgmr.msra.gmra.mrb[28].mxu0 %vm5230_vm14, %v1514_v62 }
 0xe8f   :  { %v3623_v62 = vpop.f32.mrb[28].mxu0 }
 0xe90   :  { %v3717_v9 = vadd.f32 %v3716_v22, %v3623_v62  ;;  %v3194_v34 = vpop.f32.mrb[29].mxu0 }
 0xe91   :  { %v3719_v2 = vadd.f32 %v3718_v59, %v3194_v34 }
 0xe92   :  { %v3208_v17 = vsel %vm5231_vm11, %v3717_v9, -inf }
 0xe93   :  { %3209 = vmax.xlane.f32.xlu0 %v3208_v17  ;;  %v3205_v36 = vsel %vm5232_vm13, %v3719_v2, -inf }
 0xe94   :  { %3206 = vmax.xlane.f32.xlu1 %v3205_v36 }
 0xf20   :  { %v3210_v35 = vpop.xlane.xlu0 %3209 }
 0xf21   :  { %v3212_v29 = vsub.f32 %v3717_v9, %v3210_v35  ;;  %v3207_v3 = vpop.xlane.xlu1 %3206 }
 0xf22   :  { %v3211_v25 = vsub.f32 %v3719_v2, %v3207_v3 }
 0xf23   :  { %v3215_v40 = vmul.f32 1.442695, %v3212_v29 }
 0xf24   :  { %v3213_v63 = vmul.f32 1.442695, %v3211_v25 }
 0xf25   :  { %3762 = vpow2.f32 %v3215_v40 }
 0xf26   :  { %3764 = vpow2.f32 %v3213_v63 }
 0xf2f   :  { %v3763_v32 = vpop.eup %3762 }
 0xf30   :  { %v3765_v24 = vpop.eup %3764  ;;  %v3220_v13 = vsel %vm5233_vm15, %v3763_v32, 0.0 }
 0xf31   :  { %3221 = vadd.xlane.f32.xlu0 %v3220_v13  ;;  %v3217_v58 = vsel %vm5234_vm1, %v3765_v24, 0.0 }
 0xf32   :  { %3218 = vadd.xlane.f32.xlu1 %v3217_v58 }
 0xfbe   :  { %v3222_v57 = vpop.xlane.xlu0 %3221 }
 0xfbf   :  { %3766 = vlog2.f32 %v3222_v57  ;;  %v3219_v38 = vpop.xlane.xlu1 %3218 }
 0xfc0   :  { %3768 = vlog2.f32 %v3219_v38 }
 0xfc9   :  { %v3767_v30 = vpop.eup %3766 }
 0xfca   :  { %v3769_v60 = vpop.eup %3768  ;;  %v3226_v7 = vmul.f32 0.6931472, %v3767_v30 }
 0xfcb   :  { %v3224_v43 = vmul.f32 0.6931472, %v3769_v60 }
 0xfcc   :  { %v3228_v18 = vsub.f32 %v3212_v29, %v3226_v7 }
 0xfcd   :  { %v3227_v33 = vsub.f32 %v3211_v25, %v3224_v43 }
 0xfce   :  { %3230 = vst.msk [vmem:[%s4999_s23 + $0x8] sm:$0xff] %vm5235_vm6, %v3228_v18 }
 0xfcf   :  { %3229 = vst.msk [vmem:[%s4999_s23] sm:$0xff] %vm5236_vm7, %v3227_v33 }

</bundles_post_ra>
